<compile_context>
chip_gen: v7x
topology: tpu7x:2x2x1
jax: 0.10.0
libtpu: 0.0.40
codegen_flags: <defaults>
</compile_context>

<pallas_src>
import functools

import jax
import jax.numpy as jnp
from jax.experimental import pallas as pl
from jax.experimental.pallas import tpu as pltpu


def _round_up(x: int, m: int) -> int:
    return (x + m - 1) // m * m


def _select_tile_n(n: int, max_tile: int) -> int:
    """Rows per grid step. Small graphs -> 1-2 balanced tiles; large -> max_tile."""
    n8 = _round_up(n, 8)
    if n8 > max_tile:
        return max_tile
    # Two equal tiles when possible so a v7x megacore can shard the "parallel"
    # axis over both TensorCores with zero padded rows; on 1-TC v5e/v6e the
    # extra grid step only costs ~0.35us.
    if n8 % 16 == 0 and n8 >= 16:
        return n8 // 2
    return n8


# ---------------------------------------------------------------------------
# Kernel
# ---------------------------------------------------------------------------
def encoder_kernel(x_ref, w1_ref, w23_ref, b123_ref, w4_ref, b4gb_ref, o_ref):
    """One tile of nodes through the 4-layer MLP + LayerNorm.

    Shapes inside the kernel (H_pad = lane-padded hidden width, H = real width):
      x_ref    : [tile_n, F]        f32
      w1_ref   : [F, H_pad]         f32   (pre-transposed to [in, out])
      w23_ref  : [2, H_pad, H_pad]  bf16  (w2, w3 stacked, zero padded)
      b123_ref : [3, H_pad]         f32   (b1, b2, b3, zero padded)
      w4_ref   : [H_pad, H]         bf16  (real output columns only)
      b4gb_ref : [3, H]             f32   (b4, gamma, beta)
      o_ref    : [tile_n, H]        f32
    """
    f32 = jnp.float32
    x = x_ref[...].astype(f32)
    b123 = b123_ref[...]
    b4gb = b4gb_ref[...]
    mm_dtype = w23_ref.dtype  # bf16 (configurable through prepared params)

    # Linear 1 + ReLU (tiny K = F; f32 dot, no F padding).
    h = jnp.dot(x, w1_ref[...], preferred_element_type=f32) + b123[0:1, :]
    h = jnp.maximum(h, 0.0)
    # Linear 2 + ReLU (lane-dense [H_pad, H_pad] bf16 MXU matmul, f32 acc).
    h = jnp.dot(h.astype(mm_dtype), w23_ref[0], preferred_element_type=f32) + b123[1:2, :]
    h = jnp.maximum(h, 0.0)
    # Linear 3 + ReLU
    h = jnp.dot(h.astype(mm_dtype), w23_ref[1], preferred_element_type=f32) + b123[2:3, :]
    h = jnp.maximum(h, 0.0)
    # Linear 4: projects directly to the real H output lanes (no padded cols).
    y = jnp.dot(h.astype(mm_dtype), w4_ref[...], preferred_element_type=f32) + b4gb[0:1, :]

    # LayerNorm over the real H features (PyTorch semantics, eps = 1e-5).
    inv_h = 1.0 / y.shape[-1]
    mean = jnp.sum(y, axis=-1, keepdims=True) * inv_h
    diff = y - mean
    var = jnp.sum(diff * diff, axis=-1, keepdims=True) * inv_h
    y_norm = diff * jax.lax.rsqrt(var + 1e-5)
    o_ref[...] = (y_norm * b4gb[1:2, :] + b4gb[2:3, :]).astype(o_ref.dtype)


# ---------------------------------------------------------------------------
# One-time parameter preparation (hoisted out of the forward pass)
# ---------------------------------------------------------------------------
def prepare_encoder_params(params, *, compute_dtype=jnp.bfloat16):
    """Pad / stack / cast the module parameters once; reuse across forwards."""
    (w1, b1, w2, b2, w3, b3, w4, b4, gamma, beta) = params
    F, H = w1.shape
    H_pad = max(128, _round_up(H, 128))  # lane-dense hidden width

    def pad_out(a):  # pad the output (lane) dim with zeros
        return jnp.pad(a, ((0, 0), (0, H_pad - a.shape[1])))

    w1p = pad_out(w1).astype(jnp.float32)                                # [F, H_pad]
    w2p = jnp.pad(w2, ((0, H_pad - H), (0, H_pad - H)))                  # [H_pad, H_pad]
    w3p = jnp.pad(w3, ((0, H_pad - H), (0, H_pad - H)))
    w23 = jnp.stack([w2p, w3p]).astype(compute_dtype)                    # [2, H_pad, H_pad]
    w4p = jnp.pad(w4, ((0, H_pad - H), (0, 0))).astype(compute_dtype)    # [H_pad, H]
    b123 = jnp.concatenate([pad_out(b1), pad_out(b2), pad_out(b3)],
                           axis=0).astype(jnp.float32)                   # [3, H_pad]
    b4gb = jnp.concatenate([b4, gamma, beta], axis=0).astype(jnp.float32)  # [3, H]
    return (w1p, w23, b123, w4p, b4gb)


# ---------------------------------------------------------------------------
# Forward pass (jit-friendly; only row padding happens per call)
# ---------------------------------------------------------------------------
def encoder_forward(node_attr, prepared, *, max_tile_n: int = 1024):
    """node_attr: [N, F] float32. Returns encoded node features [N, H] float32."""
    w1p, w23, b123, w4p, b4gb = prepared
    N, F = node_attr.shape
    H_pad, H = w4p.shape

    tile_n = _select_tile_n(N, max_tile_n)
    N_pad = _round_up(N, tile_n)
    x = node_attr if N_pad == N else jnp.pad(node_attr, ((0, N_pad - N), (0, 0)))

    cost = pl.CostEstimate(
        flops=int(2 * N_pad * (F * H_pad + 2 * H_pad * H_pad + H_pad * H) + 8 * N_pad * H),
        transcendentals=int(N_pad),
        bytes_accessed=int(
            N_pad * F * 4 + N_pad * H * 4
            + w1p.size * w1p.dtype.itemsize + w23.size * w23.dtype.itemsize
            + w4p.size * w4p.dtype.itemsize
            + (b123.size + b4gb.size) * 4),
    )

    out = pl.pallas_call(
        encoder_kernel,
        out_shape=jax.ShapeDtypeStruct((N_pad, H), jnp.float32),
        grid=(N_pad // tile_n,),
        in_specs=[
            pl.BlockSpec((tile_n, F), lambda i: (i, 0)),            # node tile
            pl.BlockSpec((F, H_pad), lambda i: (0, 0)),             # w1
            pl.BlockSpec((2, H_pad, H_pad), lambda i: (0, 0, 0)),   # w2, w3
            pl.BlockSpec((3, H_pad), lambda i: (0, 0)),             # b1..b3
            pl.BlockSpec((H_pad, H), lambda i: (0, 0)),             # w4 (real cols)
            pl.BlockSpec((3, H), lambda i: (0, 0)),                 # b4, gamma, beta
        ],
        out_specs=pl.BlockSpec((tile_n, H), lambda i: (i, 0)),
        compiler_params=pltpu.CompilerParams(
            dimension_semantics=("parallel",)),
        cost_estimate=cost,
    )(x, w1p, w23, b123, w4p, b4gb)

    return out if N_pad == N else out[:N]


# ---------------------------------------------------------------------------
# Parameters / references
# ---------------------------------------------------------------------------
def init_params(key, node_attr_size, latent_dim_size):
    """Deterministic synthetic parameters (same shapes as the PyTorch module).

    Linear weights are stored already transposed to [in, out]; biases as [1, out].
    """
    F, H = node_attr_size, latent_dim_size
    keys = jax.random.split(key, 8)

    def lin(kw, kb, din, dout):
        w = jax.random.normal(kw, (din, dout), jnp.float32) * (1.0 / jnp.sqrt(din))
        b = jax.random.normal(kb, (1, dout), jnp.float32) * 0.01
        return w, b

    w1, b1 = lin(keys[0], keys[1], F, H)
    w2, b2 = lin(keys[2], keys[3], H, H)
    w3, b3 = lin(keys[4], keys[5], H, H)
    w4, b4 = lin(keys[6], keys[7], H, H)
    gamma = jnp.ones((1, H), jnp.float32)
    beta = jnp.zeros((1, H), jnp.float32)
    return (w1, b1, w2, b2, w3, b3, w4, b4, gamma, beta)


def reference_forward(node_attr, params, *, matmul_dtype=jnp.float32):
    """Plain-JAX reference matching the PyTorch forward semantics.

    With matmul_dtype=bfloat16 it mirrors the kernel's precision policy
    (bf16 matmul inputs for hidden layers, f32 accumulation) for a tight check.
    """
    (w1, b1, w2, b2, w3, b3, w4, b4, gamma, beta) = params

    def mm(a, w):
        return jnp.dot(a.astype(matmul_dtype), w.astype(matmul_dtype),
                       preferred_element_type=jnp.float32)

    h = jnp.maximum(node_attr @ w1 + b1, 0.0)       # layer 1 is f32 in the kernel too
    h = jnp.maximum(mm(h, w2) + b2, 0.0)
    h = jnp.maximum(mm(h, w3) + b3, 0.0)
    y = mm(h, w4) + b4
    mean = jnp.mean(y, axis=-1, keepdims=True)
    var = jnp.mean((y - mean) ** 2, axis=-1, keepdims=True)
    return (y - mean) / jnp.sqrt(var + 1e-5) * gamma + beta


if __name__ == "__main__":
    node_attr_size = 4
    latent_dim_size = 32
    num_nodes = 384          # -> 2 balanced tiles of 192 rows, zero row padding
    num_edges = 512

    key = jax.random.PRNGKey(0)
    k_x, k_p, k_e = jax.random.split(key, 3)

    node_attr = jax.random.normal(k_x, (num_nodes, node_attr_size), jnp.float32)
    # edge_index: metadata only; passed through unchanged (no compute).
    edge_index = jax.random.randint(k_e, (2, num_edges), 0, num_nodes, jnp.int32)

    params = init_params(k_p, node_attr_size, latent_dim_size)
    prepared = prepare_encoder_params(params)        # one-time padding / stacking / cast

    encoder_fn = jax.jit(encoder_forward)
    out = jax.block_until_ready(encoder_fn(node_attr, prepared))
    assert out.shape == (num_nodes, latent_dim_size)

    # Tight check vs. a reference with the kernel's exact precision policy.
    ref_matched = reference_forward(node_attr, params, matmul_dtype=jnp.bfloat16)
    assert jnp.allclose(out, ref_matched, atol=2e-3, rtol=2e-3), "mismatch vs matched-precision reference"

    # Sanity check vs. the full-f32 PyTorch-semantics reference (bf16 matmul
    # rounding on unit-scale LayerNorm outputs stays well under this bound).
    ref_f32 = reference_forward(node_attr, params, matmul_dtype=jnp.float32)
    assert float(jnp.max(jnp.abs(out - ref_f32))) < 0.2, "drifted too far from f32 reference"

    # Encoder returns Data(x=node_, edge_index=edge_index) -> here a plain tuple.
    encoded_graph = (out, edge_index)
    _ = encoded_graph

    print("KERNEL_OK")
</pallas_src>

<mosaic_0001>
module attributes {stable_mosaic.version = 11 : i64} {
  func.func @encoder_kernel(%arg0: i32, %arg1: memref<192x4xf32, #tpu.memory_space<vmem>>, %arg2: memref<4x128xf32, #tpu.memory_space<vmem>>, %arg3: memref<2x128x128xbf16, #tpu.memory_space<vmem>>, %arg4: memref<3x128xf32, #tpu.memory_space<vmem>>, %arg5: memref<128x32xbf16, #tpu.memory_space<vmem>>, %arg6: memref<3x32xf32, #tpu.memory_space<vmem>>, %arg7: memref<192x32xf32, #tpu.memory_space<vmem>>) attributes {dimension_semantics = [#tpu.dimension_semantics<parallel>], iteration_bounds = array<i64: 2>, scalar_prefetch = 0 : i64, scratch_operands = 0 : i64, tpu.core_type = #tpu.core_type<tc>, window_params = [{transform_indices = @transform_0, window_bounds = array<i64: 192, 4>}, {pipeline_mode = #tpu.pipeline_mode<synchronous>, transform_indices = @transform_1, window_bounds = array<i64: 4, 128>}, {pipeline_mode = #tpu.pipeline_mode<synchronous>, transform_indices = @transform_2, window_bounds = array<i64: 2, 128, 128>}, {pipeline_mode = #tpu.pipeline_mode<synchronous>, transform_indices = @transform_3, window_bounds = array<i64: 3, 128>}, {pipeline_mode = #tpu.pipeline_mode<synchronous>, transform_indices = @transform_4, window_bounds = array<i64: 128, 32>}, {pipeline_mode = #tpu.pipeline_mode<synchronous>, transform_indices = @transform_5, window_bounds = array<i64: 3, 32>}, {transform_indices = @transform_6, window_bounds = array<i64: 192, 32>}]} {
    %c0 = arith.constant 0 : index
    %c0_0 = arith.constant 0 : index
    %0 = vector.load %arg1[%c0, %c0_0] : memref<192x4xf32, #tpu.memory_space<vmem>>, vector<192x4xf32>
    %c0_1 = arith.constant 0 : index
    %c0_2 = arith.constant 0 : index
    %1 = vector.load %arg4[%c0_1, %c0_2] : memref<3x128xf32, #tpu.memory_space<vmem>>, vector<3x128xf32>
    %c0_3 = arith.constant 0 : index
    %c0_4 = arith.constant 0 : index
    %2 = vector.load %arg6[%c0_3, %c0_4] : memref<3x32xf32, #tpu.memory_space<vmem>>, vector<3x32xf32>
    %c0_5 = arith.constant 0 : index
    %c0_6 = arith.constant 0 : index
    %3 = vector.load %arg2[%c0_5, %c0_6] : memref<4x128xf32, #tpu.memory_space<vmem>>, vector<4x128xf32>
    %cst = arith.constant dense<0.000000e+00> : vector<192x128xf32>
    %4 = tpu.matmul %0, %3, %cst {dimension_numbers = #tpu.dot_dimension_numbers<[1], [0], [0], [1], [0, 0, 1, 1], [], []>} : vector<192x4xf32>, vector<4x128xf32>, vector<192x128xf32> -> vector<192x128xf32>
    %5 = vector.extract_strided_slice %1 {offsets = [0, 0], sizes = [1, 128], strides = [1, 1]} : vector<3x128xf32> to vector<1x128xf32>
    %6 = vector.broadcast %5 : vector<1x128xf32> to vector<192x128xf32>
    %7 = arith.addf %4, %6 : vector<192x128xf32>
    %cst_7 = arith.constant 0.000000e+00 : f32
    %8 = vector.broadcast %cst_7 : f32 to vector<192x128xf32>
    %9 = arith.maximumf %7, %8 : vector<192x128xf32>
    %10 = arith.truncf %9 : vector<192x128xf32> to vector<192x128xbf16>
    %c0_8 = arith.constant 0 : index
    %c0_9 = arith.constant 0 : index
    %c0_10 = arith.constant 0 : index
    %11 = vector.load %arg3[%c0_8, %c0_9, %c0_10] : memref<2x128x128xbf16, #tpu.memory_space<vmem>>, vector<1x128x128xbf16>
    %12 = vector.shape_cast %11 : vector<1x128x128xbf16> to vector<128x128xbf16>
    %cst_11 = arith.constant dense<0.000000e+00> : vector<192x128xf32>
    %13 = tpu.matmul %10, %12, %cst_11 {dimension_numbers = #tpu.dot_dimension_numbers<[1], [0], [0], [1], [0, 0, 1, 1], [], []>} : vector<192x128xbf16>, vector<128x128xbf16>, vector<192x128xf32> -> vector<192x128xf32>
    %14 = vector.extract_strided_slice %1 {offsets = [1, 0], sizes = [1, 128], strides = [1, 1]} : vector<3x128xf32> to vector<1x128xf32>
    %15 = vector.broadcast %14 : vector<1x128xf32> to vector<192x128xf32>
    %16 = arith.addf %13, %15 : vector<192x128xf32>
    %cst_12 = arith.constant 0.000000e+00 : f32
    %17 = vector.broadcast %cst_12 : f32 to vector<192x128xf32>
    %18 = arith.maximumf %16, %17 : vector<192x128xf32>
    %19 = arith.truncf %18 : vector<192x128xf32> to vector<192x128xbf16>
    %c1 = arith.constant 1 : index
    %c0_13 = arith.constant 0 : index
    %c0_14 = arith.constant 0 : index
    %20 = vector.load %arg3[%c1, %c0_13, %c0_14] : memref<2x128x128xbf16, #tpu.memory_space<vmem>>, vector<1x128x128xbf16>
    %21 = vector.shape_cast %20 : vector<1x128x128xbf16> to vector<128x128xbf16>
    %cst_15 = arith.constant dense<0.000000e+00> : vector<192x128xf32>
    %22 = tpu.matmul %19, %21, %cst_15 {dimension_numbers = #tpu.dot_dimension_numbers<[1], [0], [0], [1], [0, 0, 1, 1], [], []>} : vector<192x128xbf16>, vector<128x128xbf16>, vector<192x128xf32> -> vector<192x128xf32>
    %23 = vector.extract_strided_slice %1 {offsets = [2, 0], sizes = [1, 128], strides = [1, 1]} : vector<3x128xf32> to vector<1x128xf32>
    %24 = vector.broadcast %23 : vector<1x128xf32> to vector<192x128xf32>
    %25 = arith.addf %22, %24 : vector<192x128xf32>
    %cst_16 = arith.constant 0.000000e+00 : f32
    %26 = vector.broadcast %cst_16 : f32 to vector<192x128xf32>
    %27 = arith.maximumf %25, %26 : vector<192x128xf32>
    %28 = arith.truncf %27 : vector<192x128xf32> to vector<192x128xbf16>
    %c0_17 = arith.constant 0 : index
    %c0_18 = arith.constant 0 : index
    %29 = vector.load %arg5[%c0_17, %c0_18] : memref<128x32xbf16, #tpu.memory_space<vmem>>, vector<128x32xbf16>
    %cst_19 = arith.constant dense<0.000000e+00> : vector<192x32xf32>
    %30 = tpu.matmul %28, %29, %cst_19 {dimension_numbers = #tpu.dot_dimension_numbers<[1], [0], [0], [1], [0, 0, 1, 1], [], []>} : vector<192x128xbf16>, vector<128x32xbf16>, vector<192x32xf32> -> vector<192x32xf32>
    %31 = vector.extract_strided_slice %2 {offsets = [0, 0], sizes = [1, 32], strides = [1, 1]} : vector<3x32xf32> to vector<1x32xf32>
    %32 = vector.broadcast %31 : vector<1x32xf32> to vector<192x32xf32>
    %33 = arith.addf %30, %32 : vector<192x32xf32>
    %cst_20 = arith.constant dense<0.000000e+00> : vector<192xf32>
    %34 = vector.multi_reduction <add>, %33, %cst_20 [1] : vector<192x32xf32> to vector<192xf32>
    %35 = vector.shape_cast %34 : vector<192xf32> to vector<192x1xf32>
    %cst_21 = arith.constant 3.125000e-02 : f32
    %36 = vector.broadcast %cst_21 : f32 to vector<192x1xf32>
    %37 = arith.mulf %35, %36 : vector<192x1xf32>
    %38 = vector.broadcast %37 : vector<192x1xf32> to vector<192x32xf32>
    %39 = arith.subf %33, %38 : vector<192x32xf32>
    %40 = arith.mulf %39, %39 : vector<192x32xf32>
    %cst_22 = arith.constant dense<0.000000e+00> : vector<192xf32>
    %41 = vector.multi_reduction <add>, %40, %cst_22 [1] : vector<192x32xf32> to vector<192xf32>
    %42 = vector.shape_cast %41 : vector<192xf32> to vector<192x1xf32>
    %cst_23 = arith.constant 3.125000e-02 : f32
    %43 = vector.broadcast %cst_23 : f32 to vector<192x1xf32>
    %44 = arith.mulf %42, %43 : vector<192x1xf32>
    %cst_24 = arith.constant 9.99999974E-6 : f32
    %45 = vector.broadcast %cst_24 : f32 to vector<192x1xf32>
    %46 = arith.addf %44, %45 : vector<192x1xf32>
    %47 = math.rsqrt %46 : vector<192x1xf32>
    %48 = vector.broadcast %47 : vector<192x1xf32> to vector<192x32xf32>
    %49 = arith.mulf %39, %48 : vector<192x32xf32>
    %50 = vector.extract_strided_slice %2 {offsets = [1, 0], sizes = [1, 32], strides = [1, 1]} : vector<3x32xf32> to vector<1x32xf32>
    %51 = vector.broadcast %50 : vector<1x32xf32> to vector<192x32xf32>
    %52 = arith.mulf %49, %51 : vector<192x32xf32>
    %53 = vector.extract_strided_slice %2 {offsets = [2, 0], sizes = [1, 32], strides = [1, 1]} : vector<3x32xf32> to vector<1x32xf32>
    %54 = vector.broadcast %53 : vector<1x32xf32> to vector<192x32xf32>
    %55 = arith.addf %52, %54 : vector<192x32xf32>
    %c0_25 = arith.constant 0 : index
    %c0_26 = arith.constant 0 : index
    %56 = vector.load %arg7[%c0_25, %c0_26] : memref<192x32xf32, #tpu.memory_space<vmem>>, vector<192x32xf32>
    tpu.vector_store %arg7[%c0_25, %c0_26], %55 {strides = array<i32>} : memref<192x32xf32, #tpu.memory_space<vmem>>, vector<192x32xf32>,
    return
  }
  func.func @transform_0(%arg0: i32) -> (i32, i32) {
    %c0_i32 = arith.constant 0 : i32
    %c0_i32_0 = arith.constant 0 : i32
    return %arg0, %c0_i32 : i32, i32
  }
  func.func @transform_1(%arg0: i32) -> (i32, i32) {
    %c0_i32 = arith.constant 0 : i32
    %c0_i32_0 = arith.constant 0 : i32
    %c0_i32_1 = arith.constant 0 : i32
    return %c0_i32, %c0_i32_0 : i32, i32
  }
  func.func @transform_2(%arg0: i32) -> (i32, i32, i32) {
    %c0_i32 = arith.constant 0 : i32
    %c0_i32_0 = arith.constant 0 : i32
    %c0_i32_1 = arith.constant 0 : i32
    %c0_i32_2 = arith.constant 0 : i32
    return %c0_i32, %c0_i32_0, %c0_i32_1 : i32, i32, i32
  }
  func.func @transform_3(%arg0: i32) -> (i32, i32) {
    %c0_i32 = arith.constant 0 : i32
    %c0_i32_0 = arith.constant 0 : i32
    %c0_i32_1 = arith.constant 0 : i32
    return %c0_i32, %c0_i32_0 : i32, i32
  }
  func.func @transform_4(%arg0: i32) -> (i32, i32) {
    %c0_i32 = arith.constant 0 : i32
    %c0_i32_0 = arith.constant 0 : i32
    %c0_i32_1 = arith.constant 0 : i32
    return %c0_i32, %c0_i32_0 : i32, i32
  }
  func.func @transform_5(%arg0: i32) -> (i32, i32) {
    %c0_i32 = arith.constant 0 : i32
    %c0_i32_0 = arith.constant 0 : i32
    %c0_i32_1 = arith.constant 0 : i32
    return %c0_i32, %c0_i32_0 : i32, i32
  }
  func.func @transform_6(%arg0: i32) -> (i32, i32) {
    %c0_i32 = arith.constant 0 : i32
    %c0_i32_0 = arith.constant 0 : i32
    return %arg0, %c0_i32 : i32, i32
  }
}

</mosaic_0001>

<bundles_post_ra>
// kernel: encoder_forward.1
= control target key start
LH: loop header
LB: loop body
LE: loop exit
PB: predicated region body
PF: predicated region fallthrough
CT: control target
= control target key end

     0   :  { %s2154_s21 = smov 0   ;;  %s2830_s0 = inlined_call_operand.vmem [shape: f32[384,4], index: 0, kind: input, shape index: {}]   ;;  %s2831_s1 = inlined_call_operand.vmem [shape: f32[4,128], index: 1, kind: input, shape index: {}]   ;;  %s2832_s2 = inlined_call_operand.vmem [shape: bf16[2,128,128], index: 2, kind: input, shape index: {}]   ;;  %s2833_s3 = inlined_call_operand.vmem [shape: f32[3,128], index: 3, kind: input, shape index: {}]   ;;  %s2834_s4 = inlined_call_operand.vmem [shape: bf16[128,32], index: 4, kind: input, shape index: {}]   ;;  %s2835_s5 = inlined_call_operand.vmem [shape: f32[3,32], index: 5, kind: input, shape index: {}]   ;;  %s2836_s6 = inlined_call_operand.vmem [shape: f32[384,32], index: 6, kind: output, shape index: {}]  }
   0x1 LB: > { %s1698_s22 = sadd.s32 4294967295, %s2117_s21   ;;  %p1702_p0 = scmp.ge.s32.totalorder %s2117_s21, 1  ;;  %s2117_s21 = sphi %s2154_s21, %s16_s21  }
   0x2   : > { %p213_p1 = scmp.lt.s32.totalorder %s2117_s21, 3 }
   0x4   : > { %p214_p2 = pnand %p1702_p0, %p213_p1 }
   0x5   : > { %v282_v0 = vld [vmem:[%s2831_s1] sm:$0xf] (!%p214_p2)  ;;  %vm360_vm0 = vcmask (!%p214_p2), 1043456   ;;  %s243_s25 = smul.u32 (!%p214_p2), 24, %s1698_s22  ;;  %v2040_v2 = vld [vmem:[%s2832_s2 + $0x8] sm:$0xff] (!%p214_p2)   ;;  %v2041_v3 = vld [vmem:[%s2832_s2 + $0x10] sm:$0xff] (!%p214_p2)   ;;  %v283_v40 = vlaneseq (!%p214_p2) }
   0x6   : > { %217 = sbr.rel (%p214_p2) target bundleno = 1261 (0x4ed), region = 44  ;;  %v2039_v1 = vld [vmem:[%s2832_s2] sm:$0xff] (!%p214_p2)   ;;  %1857 = vmatprep.subr.msk.mxu0 (!%p214_p2), %vm360_vm0, %v282_v0  ;;  %vm287_vm1 = vcmask (!%p214_p2), 31744   ;;  %v2042_v4 = vld [vmem:[%s2832_s2 + $0x18] sm:$0xff] (!%p214_p2)   ;;  %v2044_v30 = vld [vmem:[%s2832_s2 + $0x28] sm:$0xff] (!%p214_p2)   ;;  %vm1249_vm2 = vcmask (!%p214_p2), 261120  }
   0x7   : > { %1858 = vmatpush3.msk.msra.mxu0 (!%p214_p2), %vm360_vm0, %v282_v0  ;;  %p244_p3 = scmp.lt.s32.totalorder (!%p214_p2), %s243_s25, 47  ;;  %1895 = vmatprep.subr.bf16.mxu1 (!%p214_p2), %v2039_v1  ;;  %v2043_v10 = vld [vmem:[%s2832_s2 + $0x20] sm:$0xff] (!%p214_p2)   ;;  %v2045_v31 = vld [vmem:[%s2832_s2 + $0x30] sm:$0xff] (!%p214_p2)   ;;  %v2046_v32 = vld [vmem:[%s2832_s2 + $0x38] sm:$0xff] (!%p214_p2)   ;;  %v2268_v41 = vshrl.u32 (!%p214_p2), %v283_v40, 7 }
   0x8   : > { %1896 = vmatpush3.bf16.msra.mxu1 (!%p214_p2), %v2039_v1  ;;  %v2047_v33 = vld [vmem:[%s2832_s2 + $0x40] sm:$0xff] (!%p214_p2)   ;;  %v2048_v34 = vld [vmem:[%s2832_s2 + $0x48] sm:$0xff] (!%p214_p2)   ;;  %v2049_v35 = vld [vmem:[%s2832_s2 + $0x50] sm:$0xff] (!%p214_p2)  }
   0x9   : > { %1897 = vmatprep.subr.bf16.mxu1 (!%p214_p2), %v2040_v2  ;;  %1935 = vmatprep.subr.bf16.mxu0 (!%p214_p2), %v2047_v33  ;;  %v2050_v36 = vld [vmem:[%s2832_s2 + $0x58] sm:$0xff] (!%p214_p2)   ;;  %v2051_v37 = vld [vmem:[%s2832_s2 + $0x60] sm:$0xff] (!%p214_p2)   ;;  %v2052_v38 = vld [vmem:[%s2832_s2 + $0x68] sm:$0xff] (!%p214_p2)   ;;  %v285_v42 = vsub.s32 (!%p214_p2), 0, %v2268_v41 }
   0xa   : > { %v2053_v39 = vld [vmem:[%s2832_s2 + $0x70] sm:$0xff] (!%p214_p2)   ;;  %v2274_v43 = vld [vmem:[%s2833_s3] sm:$0x7] (!%p214_p2) }
   0xb   : > { %v2279_v44 = vrot.slane (!%p214_p2), %v2274_v43, %v285_v42 }
   0xc   : > { %1898 = vmatpush3.bf16.msra.mxu1 (!%p214_p2), %v2040_v2 }
   0xd   : > { %s2838_s25 = smov (!%p244_p3, %s243_s25), 47  ;;  %1899 = vmatprep.subr.bf16.mxu1 %v2041_v3 }
   0xe   : > { %s1703_s8 = sshll.u32 %s2838_s25, 3 }
   0xf   : > { %s2185_s13 = scalar_lea.vmem %s2830_s0, %s1703_s8  ;;  %s2707_s18 = scalar_lea.vmem %s2836_s6, %s1703_s8 }
  0x10   : > { %v256_v5 = vld [vmem:[%s2185_s13] sm:$0xff]  ;;  %v257_v6 = vld [vmem:[%s2185_s13 + $0x8] sm:$0xff]  ;;  %v258_v7 = vld [vmem:[%s2185_s13 + $0x10] sm:$0xff]  ;;  %1900 = vmatpush3.bf16.msra.mxu1 %v2041_v3 }
  0x11   : > { %1859 = vmatprep.mubr.msk.f32.mxu0 %vm287_vm1, %v256_v5  ;;  %v259_v8 = vld [vmem:[%s2185_s13 + $0x18] sm:$0xff]  ;;  %v260_v9 = vld [vmem:[%s2185_s13 + $0x20] sm:$0xff]  ;;  %1901 = vmatprep.subr.bf16.mxu1 %v2042_v4  ;;  %v261_v11 = vld [vmem:[%s2185_s13 + $0x28] sm:$0xff] }
  0x12   : > { %1860 = vmatmul.mubr.msk.f32.vlgmr.msra.gmra.mrb[0].mxu0 %vm287_vm1, %v257_v6  ;;  %v262_v12 = vld [vmem:[%s2185_s13 + $0x30] sm:$0xff]  ;;  %v263_v13 = vld [vmem:[%s2185_s13 + $0x38] sm:$0xff]  ;;  %v264_v14 = vld [vmem:[%s2185_s13 + $0x40] sm:$0xff] }
  0x13   : > { %1862 = vmatprep.mubr.msk.f32.mxu0 %vm287_vm1, %v258_v7  ;;  %v265_v15 = vld [vmem:[%s2185_s13 + $0x48] sm:$0xff]  ;;  %v266_v16 = vld [vmem:[%s2185_s13 + $0x50] sm:$0xff]  ;;  %v267_v17 = vld [vmem:[%s2185_s13 + $0x58] sm:$0xff]  ;;  %1936 = vmatpush3.bf16.msra.mxu0 %v2047_v33 }
  0x14   : > { %1902 = vmatpush3.bf16.msra.mxu1 %v2042_v4  ;;  %v268_v18 = vld [vmem:[%s2185_s13 + $0x60] sm:$0xff]  ;;  %v269_v19 = vld [vmem:[%s2185_s13 + $0x68] sm:$0xff]  ;;  %v270_v20 = vld [vmem:[%s2185_s13 + $0x70] sm:$0xff]  ;;  %1937 = vmatprep.subr.bf16.mxu0 %v2048_v34 }
  0x15   : > { %1903 = vmatprep.subr.bf16.mxu1 %v2043_v10  ;;  %v271_v21 = vld [vmem:[%s2185_s13 + $0x78] sm:$0xff]  ;;  %v272_v22 = vld [vmem:[%s2185_s13 + $0x80] sm:$0xff]  ;;  %v273_v23 = vld [vmem:[%s2185_s13 + $0x88] sm:$0xff] }
  0x16   : > { %1863 = vmatmul.mubr.msk.f32.gmra.mrb[2].mxu0 %vm287_vm1, %v259_v8  ;;  %v274_v24 = vld [vmem:[%s2185_s13 + $0x90] sm:$0xff]  ;;  %v275_v25 = vld [vmem:[%s2185_s13 + $0x98] sm:$0xff]  ;;  %v276_v26 = vld [vmem:[%s2185_s13 + $0xa0] sm:$0xff] }
  0x17   : > { %1865 = vmatprep.mubr.msk.f32.mxu0 %vm287_vm1, %v260_v9  ;;  %v277_v27 = vld [vmem:[%s2185_s13 + $0xa8] sm:$0xff]  ;;  %v278_v28 = vld [vmem:[%s2185_s13 + $0xb0] sm:$0xff]  ;;  %v279_v29 = vld [vmem:[%s2185_s13 + $0xb8] sm:$0xff]  ;;  %1938 = vmatpush3.bf16.msra.mxu0 %v2048_v34 }
  0x18   : > { %1904 = vmatpush3.bf16.msra.mxu1 %v2043_v10  ;;  %1939 = vmatprep.subr.bf16.mxu0 %v2049_v35 }
  0x19   : > { %1905 = vmatprep.subr.bf16.mxu1 %v2044_v30 }
  0x1a   : > { %1866 = vmatmul.mubr.msk.f32.gmra.mrb[4].mxu0 %vm287_vm1, %v261_v11 }
  0x1b   : > { %1868 = vmatprep.mubr.msk.f32.mxu0 %vm287_vm1, %v262_v12  ;;  %1940 = vmatpush3.bf16.msra.mxu0 %v2049_v35 }
  0x1c   : > { %1906 = vmatpush3.bf16.msra.mxu1 %v2044_v30  ;;  %1941 = vmatprep.subr.bf16.mxu0 %v2050_v36 }
  0x1d   : > { %1907 = vmatprep.subr.bf16.mxu1 %v2045_v31 }
  0x1e   : > { %1869 = vmatmul.mubr.msk.f32.gmra.mrb[6].mxu0 %vm287_vm1, %v263_v13 }
  0x1f   : > { %1871 = vmatprep.mubr.msk.f32.mxu0 %vm287_vm1, %v264_v14  ;;  %1942 = vmatpush3.bf16.msra.mxu0 %v2050_v36 }
  0x20   : > { %1908 = vmatpush3.bf16.msra.mxu1 %v2045_v31  ;;  %1943 = vmatprep.subr.bf16.mxu0 %v2051_v37 }
  0x21   : > { %1909 = vmatprep.subr.bf16.mxu1 %v2046_v32 }
  0x22   : > { %1872 = vmatmul.mubr.msk.f32.gmra.mrb[8].mxu0 %vm287_vm1, %v265_v15 }
  0x23   : > { %1874 = vmatprep.mubr.msk.f32.mxu0 %vm287_vm1, %v266_v16  ;;  %1944 = vmatpush3.bf16.msra.mxu0 %v2051_v37 }
  0x24   : > { %1910 = vmatpush3.bf16.msra.mxu1 %v2046_v32  ;;  %1945 = vmatprep.subr.bf16.mxu0 %v2052_v38 }
  0x26   : > { %1875 = vmatmul.mubr.msk.f32.gmra.mrb[10].mxu0 %vm287_vm1, %v267_v17 }
  0x27   : > { %1877 = vmatprep.mubr.msk.f32.mxu0 %vm287_vm1, %v268_v18  ;;  %1946 = vmatpush3.bf16.msra.mxu0 %v2052_v38 }
  0x28   : > { %1947 = vmatprep.subr.bf16.mxu0 %v2053_v39 }
  0x2a   : > { %1878 = vmatmul.mubr.msk.f32.gmra.mrb[12].mxu0 %vm287_vm1, %v269_v19 }
  0x2b   : > { %1880 = vmatprep.mubr.msk.f32.mxu0 %vm287_vm1, %v270_v20  ;;  %1948 = vmatpush3.bf16.msra.mxu0 %v2053_v39 }
  0x2e   : > { %1881 = vmatmul.mubr.msk.f32.gmra.mrb[14].mxu0 %vm287_vm1, %v271_v21 }
  0x2f   : > { %1883 = vmatprep.mubr.msk.f32.mxu0 %vm287_vm1, %v272_v22 }
  0x32   : > { %1884 = vmatmul.mubr.msk.f32.gmra.mrb[16].mxu0 %vm287_vm1, %v273_v23 }
  0x33   : > { %1886 = vmatprep.mubr.msk.f32.mxu0 %vm287_vm1, %v274_v24 }
  0x36   : > { %1887 = vmatmul.mubr.msk.f32.gmra.mrb[18].mxu0 %vm287_vm1, %v275_v25 }
  0x37   : > { %1889 = vmatprep.mubr.msk.f32.mxu0 %vm287_vm1, %v276_v26 }
  0x3a   : > { %1890 = vmatmul.mubr.msk.f32.gmra.mrb[20].mxu0 %vm287_vm1, %v277_v27 }
  0x3b   : > { %1892 = vmatprep.mubr.msk.f32.mxu0 %vm287_vm1, %v278_v28 }
  0x3e   : > { %1893 = vmatmul.mubr.msk.f32.gmra.mrb[22].mxu0 %vm287_vm1, %v279_v29 }
  0xe5   : > { %v1861_v45 = vpop.f32.mrb[0].mxu0 }
  0xe6   : > { %v436_v46 = vadd.f32 %v1861_v45, %v2279_v44  ;;  %v430_v47 = vpop.f32.mrb[1].mxu0 }
  0xe7   : > { %v431_v48 = vadd.f32 %v430_v47, %v2279_v44 }
  0xe8   : > { %v550_v49 = vmax.f32 %v436_v46, 0.0 }
  0xe9   : > { %v549_v50 = vmax.f32 %v431_v48, 0.0  ;;  %v1864_v51 = vpop.f32.mrb[2].mxu0 }
  0xea   : > { %v446_v52 = vadd.f32 %v1864_v51, %v2279_v44  ;;  %v440_v53 = vpop.f32.mrb[3].mxu0 }
  0xeb   : > { %v441_v54 = vadd.f32 %v440_v53, %v2279_v44  ;;  %v573_v55 = vpack.c.bf16 %v550_v49, %v549_v50 }
  0xec   : > { %v552_v56 = vmax.f32 %v446_v52, 0.0 }
  0xed   : > { %v551_v57 = vmax.f32 %v441_v54, 0.0  ;;  %v1867_v58 = vpop.f32.mrb[4].mxu0  ;;  %1911 = vmatprep.mubr.bf16.mxu1 %v573_v55 }
  0xee   : > { %v456_v59 = vadd.f32 %v1867_v58, %v2279_v44  ;;  %v450_v60 = vpop.f32.mrb[5].mxu0 }
  0xef   : > { %v574_v61 = vpack.c.bf16 %v552_v56, %v551_v57  ;;  %v451_v62 = vadd.f32 %v450_v60, %v2279_v44 }
  0xf0   : > { %v554_v63 = vmax.f32 %v456_v59, 0.0 }
  0xf1   : > { %v553_v0 = vmax.f32 %v451_v62, 0.0  ;;  %v1870_v1 = vpop.f32.mrb[6].mxu0  ;;  %1912 = vmatmul.mubr.bf16.vlgmr.msra.gmra.mrb[0].mxu1 %v574_v61 }
  0xf2   : > { %v466_v2 = vadd.f32 %v1870_v1, %v2279_v44  ;;  %v460_v3 = vpop.f32.mrb[7].mxu0 }
  0xf3   : > { %v575_v4 = vpack.c.bf16 %v554_v63, %v553_v0  ;;  %v461_v5 = vadd.f32 %v460_v3, %v2279_v44 }
  0xf4   : > { %v556_v6 = vmax.f32 %v466_v2, 0.0 }
  0xf5   : > { %v555_v7 = vmax.f32 %v461_v5, 0.0  ;;  %v1873_v8 = vpop.f32.mrb[8].mxu0  ;;  %1915 = vmatprep.mubr.bf16.mxu1 %v575_v4  ;;  %v2054_v5 = vld [vmem:[%s2832_s2 + $0x78] sm:$0xff]  }
  0xf6   : > { %v476_v9 = vadd.f32 %v1873_v8, %v2279_v44  ;;  %v470_v10 = vpop.f32.mrb[9].mxu0  ;;  %1949 = vmatprep.subr.bf16.mxu0 %v2054_v5  ;;  %v2320_v8 = vld [vmem:[%s2834_s4 + $0x18] sm:$0xff]  }
  0xf7   : > { %v576_v11 = vpack.c.bf16 %v556_v6, %v555_v7  ;;  %v471_v12 = vadd.f32 %v470_v10, %v2279_v44  ;;  %1950 = vmatpush3.bf16.msra.mxu0 %v2054_v5  ;;  %v2055_v6 = vld [vmem:[%s2834_s4] sm:$0xff]   ;;  %v2057_v7 = vld [vmem:[%s2834_s4 + $0x10] sm:$0xff]   ;;  %v2333_v10 = vld [vmem:[%s2834_s4 + $0x28] sm:$0xff]  }
  0xf8   : > { %v558_v13 = vmax.f32 %v476_v9, 0.0  ;;  %1975 = vmatprep.subr.bf16.mxu0 %v2055_v6  ;;  %2015 = vmatprep.subr.bf16.mxu1 %v2055_v6  ;;  %v2326_v9 = vld [vmem:[%s2834_s4 + $0x20] sm:$0xff]  }
  0xf9   : > { %v557_v14 = vmax.f32 %v471_v12, 0.0  ;;  %v1876_v15 = vpop.f32.mrb[10].mxu0  ;;  %1916 = vmatmul.mubr.bf16.gmra.mrb[4].mxu1 %v576_v11  ;;  %v2340_v11 = vld [vmem:[%s2834_s4 + $0x30] sm:$0xff]   ;;  %v603_v12 = vsub.s32 1, %v2268_v41 }
  0xfa   : > { %v486_v16 = vadd.f32 %v1876_v15, %v2279_v44  ;;  %v480_v17 = vpop.f32.mrb[11].mxu0  ;;  %2023 = vmatpush3.bf16.msra.mxu1 %v2055_v6 }
  0xfb   : > { %v577_v18 = vpack.c.bf16 %v558_v13, %v557_v14  ;;  %v481_v19 = vadd.f32 %v480_v17, %v2279_v44  ;;  %v2349_v13 = vrot.slane %v2274_v43, %v603_v12 }
  0xfc   : > { %v560_v20 = vmax.f32 %v486_v16, 0.0 }
  0xfd   : > { %v559_v21 = vmax.f32 %v481_v19, 0.0  ;;  %v1879_v22 = vpop.f32.mrb[12].mxu0  ;;  %1919 = vmatprep.mubr.bf16.mxu1 %v577_v18 }
  0xfe   : > { %v496_v23 = vadd.f32 %v1879_v22, %v2279_v44  ;;  %v490_v24 = vpop.f32.mrb[13].mxu0 }
  0xff   : > { %v578_v25 = vpack.c.bf16 %v560_v20, %v559_v21  ;;  %v491_v26 = vadd.f32 %v490_v24, %v2279_v44 }
 0x100   : > { %v562_v27 = vmax.f32 %v496_v23, 0.0 }
 0x101   : > { %v561_v28 = vmax.f32 %v491_v26, 0.0  ;;  %v1882_v29 = vpop.f32.mrb[14].mxu0  ;;  %1920 = vmatmul.mubr.bf16.gmra.mrb[8].mxu1 %v578_v25 }
 0x102   : > { %v506_v30 = vadd.f32 %v1882_v29, %v2279_v44  ;;  %v500_v31 = vpop.f32.mrb[15].mxu0 }
 0x103   : > { %v579_v32 = vpack.c.bf16 %v562_v27, %v561_v28  ;;  %v501_v33 = vadd.f32 %v500_v31, %v2279_v44 }
 0x104   : > { %v564_v34 = vmax.f32 %v506_v30, 0.0 }
 0x105   : > { %v563_v35 = vmax.f32 %v501_v33, 0.0  ;;  %v1885_v36 = vpop.f32.mrb[16].mxu0  ;;  %1923 = vmatprep.mubr.bf16.mxu1 %v579_v32 }
 0x106   : > { %v516_v37 = vadd.f32 %v1885_v36, %v2279_v44  ;;  %v510_v38 = vpop.f32.mrb[17].mxu0 }
 0x107   : > { %v580_v39 = vpack.c.bf16 %v564_v34, %v563_v35  ;;  %v511_v40 = vadd.f32 %v510_v38, %v2279_v44 }
 0x108   : > { %v566_v45 = vmax.f32 %v516_v37, 0.0 }
 0x109   : > { %v565_v46 = vmax.f32 %v511_v40, 0.0  ;;  %v1888_v47 = vpop.f32.mrb[18].mxu0  ;;  %1924 = vmatmul.mubr.bf16.gmra.mrb[12].mxu1 %v580_v39 }
 0x10a   : > { %v526_v48 = vadd.f32 %v1888_v47, %v2279_v44  ;;  %v520_v49 = vpop.f32.mrb[19].mxu0 }
 0x10b   : > { %v581_v50 = vpack.c.bf16 %v566_v45, %v565_v46  ;;  %v521_v51 = vadd.f32 %v520_v49, %v2279_v44 }
 0x10c   : > { %v568_v52 = vmax.f32 %v526_v48, 0.0 }
 0x10d   : > { %v567_v53 = vmax.f32 %v521_v51, 0.0  ;;  %v1891_v54 = vpop.f32.mrb[20].mxu0  ;;  %1927 = vmatprep.mubr.bf16.mxu1 %v581_v50 }
 0x10e   : > { %v536_v55 = vadd.f32 %v1891_v54, %v2279_v44  ;;  %v530_v56 = vpop.f32.mrb[21].mxu0 }
 0x10f   : > { %v582_v57 = vpack.c.bf16 %v568_v52, %v567_v53  ;;  %v531_v58 = vadd.f32 %v530_v56, %v2279_v44 }
 0x110   : > { %v570_v59 = vmax.f32 %v536_v55, 0.0 }
 0x111   : > { %v569_v60 = vmax.f32 %v531_v58, 0.0  ;;  %v1894_v61 = vpop.f32.mrb[22].mxu0  ;;  %1928 = vmatmul.mubr.bf16.gmra.mrb[16].mxu1 %v582_v57 }
 0x112   : > { %v546_v62 = vadd.f32 %v1894_v61, %v2279_v44  ;;  %v540_v63 = vpop.f32.mrb[23].mxu0 }
 0x113   : > { %v583_v0 = vpack.c.bf16 %v570_v59, %v569_v60  ;;  %v541_v1 = vadd.f32 %v540_v63, %v2279_v44  ;;  %v2056_v44 = vld [vmem:[%s2834_s4 + $0x8] sm:$0xff]  }
 0x114   : > { %v572_v2 = vmax.f32 %v546_v62, 0.0  ;;  %2016 = vmatprep.subr.bf16.mxu1 %v2056_v44 }
 0x115   : > { %v571_v3 = vmax.f32 %v541_v1, 0.0  ;;  %1931 = vmatprep.mubr.bf16.mxu1 %v583_v0  ;;  %2024 = vmatpush3.bf16.msra.mxu1 %v2056_v44 }
 0x116   : > { %2017 = vmatprep.subr.bf16.mxu1 %v2057_v7 }
 0x117   : > { %v584_v4 = vpack.c.bf16 %v572_v2, %v571_v3 }
 0x119   : > { %1932 = vmatmul.mubr.bf16.gmra.mrb[20].mxu1 %v584_v4 }
 0x11a   : > { %2025 = vmatpush3.bf16.msra.mxu1 %v2057_v7 }
 0x11b   : > { %2018 = vmatprep.subr.bf16.mxu1 %v2320_v8 }
 0x11e   : > { %2026 = vmatpush3.bf16.msra.mxu1 %v2320_v8 }
 0x11f   : > { %2019 = vmatprep.subr.bf16.mxu1 %v2326_v9 }
 0x122   : > { %2027 = vmatpush3.bf16.msra.mxu1 %v2326_v9 }
 0x123   : > { %2020 = vmatprep.subr.bf16.mxu1 %v2333_v10 }
 0x126   : > { %2028 = vmatpush3.bf16.msra.mxu1 %v2333_v10 }
 0x127   : > { %2021 = vmatprep.subr.bf16.mxu1 %v2340_v11 }
 0x12a   : > { %2029 = vmatpush3.bf16.msra.mxu1 %v2340_v11 }
 0x1c4   : > { %v1913_v14 = vpop.f32.mrb[0].mxu1 }
 0x1c5   : > { %v696_v15 = vadd.f32 %v1913_v14, %v2349_v13  ;;  %v687_v16 = vpop.f32.mrb[1].mxu1 }
 0x1c6   : > { %v688_v17 = vadd.f32 %v687_v16, %v2349_v13  ;;  %v1914_v18 = vpop.f32.mrb[2].mxu1 }
 0x1c7   : > { %v699_v19 = vadd.f32 %v1914_v18, %v2349_v13  ;;  %v690_v20 = vpop.f32.mrb[3].mxu1  ;;  %v784_v22 = vmax.f32 %v696_v15, 0.0 }
 0x1c8   : > { %v691_v21 = vadd.f32 %v690_v20, %v2349_v13  ;;  %v782_v24 = vmax.f32 %v688_v17, 0.0 }
 0x1c9   : > { %v785_v23 = vmax.f32 %v699_v19, 0.0 }
 0x1ca   : > { %v783_v25 = vmax.f32 %v691_v21, 0.0 }
 0x1cb   : > { %v807_v26 = vpack.c.bf16 %v785_v23, %v784_v22 }
 0x1cc   : > { %v806_v27 = vpack.c.bf16 %v783_v25, %v782_v24  ;;  %v1917_v28 = vpop.f32.mrb[4].mxu1 }
 0x1cd   : > { %v712_v29 = vadd.f32 %v1917_v28, %v2349_v13  ;;  %v703_v30 = vpop.f32.mrb[5].mxu1 }
 0x1ce   : > { %v704_v31 = vadd.f32 %v703_v30, %v2349_v13  ;;  %v1918_v32 = vpop.f32.mrb[6].mxu1  ;;  %1951 = vmatprep.mubr.bf16.mxu0 %v806_v27 }
 0x1cf   : > { %v715_v33 = vadd.f32 %v1918_v32, %v2349_v13  ;;  %v706_v34 = vpop.f32.mrb[7].mxu1  ;;  %1952 = vmatmul.mubr.bf16.vlgmr.msra.gmra.mrb[24].mxu0 %v807_v26  ;;  %v788_v36 = vmax.f32 %v712_v29, 0.0 }
 0x1d0   : > { %v707_v35 = vadd.f32 %v706_v34, %v2349_v13  ;;  %1976 = vmatpush3.bf16.msra.mxu0 %v2055_v6  ;;  %v786_v38 = vmax.f32 %v704_v31, 0.0 }
 0x1d1   : > { %v789_v37 = vmax.f32 %v715_v33, 0.0  ;;  %1977 = vmatprep.subr.bf16.mxu0 %v2056_v44 }
 0x1d2   : > { %v787_v39 = vmax.f32 %v707_v35, 0.0 }
 0x1d3   : > { %v809_v40 = vpack.c.bf16 %v789_v37, %v788_v36 }
 0x1d4   : > { %v808_v45 = vpack.c.bf16 %v787_v39, %v786_v38  ;;  %v1921_v46 = vpop.f32.mrb[8].mxu1  ;;  %1978 = vmatpush3.bf16.msra.mxu0 %v2056_v44  ;;  %v2062_v39 = vld [vmem:[%s2834_s4 + $0x38] sm:$0xff]  }
 0x1d5   : > { %v728_v47 = vadd.f32 %v1921_v46, %v2349_v13  ;;  %v719_v48 = vpop.f32.mrb[9].mxu1  ;;  %1979 = vmatprep.subr.bf16.mxu0 %v2057_v7  ;;  %2022 = vmatprep.subr.bf16.mxu1 %v2062_v39 }
 0x1d6   : > { %v720_v49 = vadd.f32 %v719_v48, %v2349_v13  ;;  %v1922_v50 = vpop.f32.mrb[10].mxu1  ;;  %1955 = vmatprep.mubr.bf16.mxu0 %v808_v45  ;;  %2030 = vmatpush3.bf16.msra.mxu1 %v2062_v39 }
 0x1d7   : > { %v731_v51 = vadd.f32 %v1922_v50, %v2349_v13  ;;  %v722_v52 = vpop.f32.mrb[11].mxu1  ;;  %1956 = vmatmul.mubr.bf16.gmra.mrb[28].mxu0 %v809_v40  ;;  %v792_v54 = vmax.f32 %v728_v47, 0.0  ;;  %v837_v40 = vsub.s32 2, %v2268_v41 }
 0x1d8   : > { %v723_v53 = vadd.f32 %v722_v52, %v2349_v13  ;;  %1980 = vmatpush3.bf16.msra.mxu0 %v2057_v7  ;;  %v790_v56 = vmax.f32 %v720_v49, 0.0 }
 0x1d9   : > { %v793_v55 = vmax.f32 %v731_v51, 0.0  ;;  %1981 = vmatprep.subr.bf16.mxu0 %v2320_v8 }
 0x1da   : > { %v791_v57 = vmax.f32 %v723_v53, 0.0 }
 0x1db   : > { %v811_v58 = vpack.c.bf16 %v793_v55, %v792_v54 }
 0x1dc   : > { %v810_v59 = vpack.c.bf16 %v791_v57, %v790_v56  ;;  %v1925_v60 = vpop.f32.mrb[12].mxu1  ;;  %1982 = vmatpush3.bf16.msra.mxu0 %v2320_v8 }
 0x1dd   : > { %v744_v61 = vadd.f32 %v1925_v60, %v2349_v13  ;;  %v735_v62 = vpop.f32.mrb[13].mxu1  ;;  %1983 = vmatprep.subr.bf16.mxu0 %v2326_v9 }
 0x1de   : > { %v736_v63 = vadd.f32 %v735_v62, %v2349_v13  ;;  %v1926_v0 = vpop.f32.mrb[14].mxu1  ;;  %1959 = vmatprep.mubr.bf16.mxu0 %v810_v59 }
 0x1df   : > { %v747_v1 = vadd.f32 %v1926_v0, %v2349_v13  ;;  %v738_v2 = vpop.f32.mrb[15].mxu1  ;;  %1960 = vmatmul.mubr.bf16.gmra.mrb[32].mxu0 %v811_v58  ;;  %v796_v4 = vmax.f32 %v744_v61, 0.0 }
 0x1e0   : > { %v739_v3 = vadd.f32 %v738_v2, %v2349_v13  ;;  %1984 = vmatpush3.bf16.msra.mxu0 %v2326_v9  ;;  %v794_v6 = vmax.f32 %v736_v63, 0.0 }
 0x1e1   : > { %v797_v5 = vmax.f32 %v747_v1, 0.0  ;;  %1985 = vmatprep.subr.bf16.mxu0 %v2333_v10 }
 0x1e2   : > { %v795_v44 = vmax.f32 %v739_v3, 0.0 }
 0x1e3   : > { %v813_v7 = vpack.c.bf16 %v797_v5, %v796_v4 }
 0x1e4   : > { %v812_v8 = vpack.c.bf16 %v795_v44, %v794_v6  ;;  %v1929_v14 = vpop.f32.mrb[16].mxu1  ;;  %1986 = vmatpush3.bf16.msra.mxu0 %v2333_v10 }
 0x1e5   : > { %v760_v15 = vadd.f32 %v1929_v14, %v2349_v13  ;;  %v751_v16 = vpop.f32.mrb[17].mxu1  ;;  %1987 = vmatprep.subr.bf16.mxu0 %v2340_v11 }
 0x1e6   : > { %v752_v17 = vadd.f32 %v751_v16, %v2349_v13  ;;  %v1930_v18 = vpop.f32.mrb[18].mxu1  ;;  %1963 = vmatprep.mubr.bf16.mxu0 %v812_v8 }
 0x1e7   : > { %v763_v9 = vadd.f32 %v1930_v18, %v2349_v13  ;;  %v754_v19 = vpop.f32.mrb[19].mxu1  ;;  %1964 = vmatmul.mubr.bf16.gmra.mrb[36].mxu0 %v813_v7  ;;  %v800_v21 = vmax.f32 %v760_v15, 0.0 }
 0x1e8   : > { %v755_v20 = vadd.f32 %v754_v19, %v2349_v13  ;;  %1988 = vmatpush3.bf16.msra.mxu0 %v2340_v11  ;;  %v798_v10 = vmax.f32 %v752_v17, 0.0 }
 0x1e9   : > { %v801_v22 = vmax.f32 %v763_v9, 0.0  ;;  %1989 = vmatprep.subr.bf16.mxu0 %v2062_v39 }
 0x1ea   : > { %v799_v23 = vmax.f32 %v755_v20, 0.0 }
 0x1eb   : > { %v815_v24 = vpack.c.bf16 %v801_v22, %v800_v21 }
 0x1ec   : > { %v814_v25 = vpack.c.bf16 %v799_v23, %v798_v10  ;;  %v1933_v26 = vpop.f32.mrb[20].mxu1  ;;  %1990 = vmatpush3.bf16.msra.mxu0 %v2062_v39 }
 0x1ed   : > { %v776_v27 = vadd.f32 %v1933_v26, %v2349_v13  ;;  %v767_v28 = vpop.f32.mrb[21].mxu1 }
 0x1ee   : > { %v768_v29 = vadd.f32 %v767_v28, %v2349_v13  ;;  %v1934_v30 = vpop.f32.mrb[22].mxu1  ;;  %1967 = vmatprep.mubr.bf16.mxu0 %v814_v25 }
 0x1ef   : > { %v779_v31 = vadd.f32 %v1934_v30, %v2349_v13  ;;  %v770_v32 = vpop.f32.mrb[23].mxu1  ;;  %1968 = vmatmul.mubr.bf16.gmra.mrb[40].mxu0 %v815_v24  ;;  %v804_v33 = vmax.f32 %v776_v27, 0.0 }
 0x1f0   : > { %v771_v11 = vadd.f32 %v770_v32, %v2349_v13  ;;  %v802_v35 = vmax.f32 %v768_v29, 0.0  ;;  %v2390_v13 = vrot.slane %v2274_v43, %v837_v40 }
 0x1f1   : > { %v805_v34 = vmax.f32 %v779_v31, 0.0 }
 0x1f2   : > { %v803_v36 = vmax.f32 %v771_v11, 0.0 }
 0x1f3   : > { %v817_v37 = vpack.c.bf16 %v805_v34, %v804_v33 }
 0x1f4   : > { %v816_v38 = vpack.c.bf16 %v803_v36, %v802_v35 }
 0x1f6   : > { %1971 = vmatprep.mubr.bf16.mxu0 %v816_v38 }
 0x1f7   : > { %1972 = vmatmul.mubr.bf16.gmra.mrb[44].mxu0 %v817_v37 }
 0x2a2   : > { %v1953_v45 = vpop.f32.mrb[24].mxu0 }
 0x2a3   : > { %v930_v46 = vadd.f32 %v1953_v45, %v2390_v13  ;;  %v921_v47 = vpop.f32.mrb[25].mxu0 }
 0x2a4   : > { %v922_v48 = vadd.f32 %v921_v47, %v2390_v13  ;;  %v1954_v49 = vpop.f32.mrb[26].mxu0 }
 0x2a5   : > { %v933_v50 = vadd.f32 %v1954_v49, %v2390_v13  ;;  %v924_v51 = vpop.f32.mrb[27].mxu0  ;;  %v1018_v53 = vmax.f32 %v930_v46, 0.0 }
 0x2a6   : > { %v925_v52 = vadd.f32 %v924_v51, %v2390_v13  ;;  %v1016_v55 = vmax.f32 %v922_v48, 0.0 }
 0x2a7   : > { %v1019_v54 = vmax.f32 %v933_v50, 0.0 }
 0x2a8   : > { %v1017_v56 = vmax.f32 %v925_v52, 0.0 }
 0x2a9   : > { %v1041_v57 = vpack.c.bf16 %v1019_v54, %v1018_v53 }
 0x2aa   : > { %v1040_v58 = vpack.c.bf16 %v1017_v56, %v1016_v55  ;;  %v1957_v43 = vpop.f32.mrb[28].mxu0 }
 0x2ab   : > { %v946_v59 = vadd.f32 %v1957_v43, %v2390_v13  ;;  %v937_v60 = vpop.f32.mrb[29].mxu0 }
 0x2ac   : > { %v938_v61 = vadd.f32 %v937_v60, %v2390_v13  ;;  %v1958_v62 = vpop.f32.mrb[30].mxu0  ;;  %1991 = vmatprep.mubr.bf16.mxu0 %v1040_v58 }
 0x2ad   : > { %v949_v63 = vadd.f32 %v1958_v62, %v2390_v13  ;;  %v940_v0 = vpop.f32.mrb[31].mxu0  ;;  %1992 = vmatmul.mubr.bf16.vlgmr.msra.gmra.mrb[48].mxu0 %v1041_v57  ;;  %v1022_v2 = vmax.f32 %v946_v59, 0.0 }
 0x2ae   : > { %v941_v1 = vadd.f32 %v940_v0, %v2390_v13  ;;  %v1020_v4 = vmax.f32 %v938_v61, 0.0 }
 0x2af   : > { %v1023_v3 = vmax.f32 %v949_v63, 0.0 }
 0x2b0   : > { %v1021_v5 = vmax.f32 %v941_v1, 0.0 }
 0x2b1   : > { %v1043_v6 = vpack.c.bf16 %v1023_v3, %v1022_v2 }
 0x2b2   : > { %v1042_v44 = vpack.c.bf16 %v1021_v5, %v1020_v4  ;;  %v1961_v7 = vpop.f32.mrb[32].mxu0  ;;  %v2419_v5 = vld [vmem:[%s2835_s5] sm:$0x7] }
 0x2b3   : > { %v962_v8 = vadd.f32 %v1961_v7, %v2390_v13  ;;  %v953_v14 = vpop.f32.mrb[33].mxu0 }
 0x2b4   : > { %v954_v15 = vadd.f32 %v953_v14, %v2390_v13  ;;  %v1962_v16 = vpop.f32.mrb[34].mxu0  ;;  %1995 = vmatprep.mubr.bf16.mxu1 %v1042_v44 }
 0x2b5   : > { %v965_v17 = vadd.f32 %v1962_v16, %v2390_v13  ;;  %v956_v18 = vpop.f32.mrb[35].mxu0  ;;  %1996 = vmatmul.mubr.bf16.vlgmr.msra.gmra.mrb[24].mxu1 %v1043_v6  ;;  %v1026_v19 = vmax.f32 %v962_v8, 0.0  ;;  %v2424_v6 = vrot.slane %v2419_v5, %v285_v42 }
 0x2b6   : > { %v957_v9 = vadd.f32 %v956_v18, %v2390_v13  ;;  %v1024_v21 = vmax.f32 %v954_v15, 0.0 }
 0x2b7   : > { %v1027_v20 = vmax.f32 %v965_v17, 0.0 }
 0x2b8   : > { %v1025_v22 = vmax.f32 %v957_v9, 0.0 }
 0x2b9   : > { %v1045_v10 = vpack.c.bf16 %v1027_v20, %v1026_v19 }
 0x2ba   : > { %v1044_v23 = vpack.c.bf16 %v1025_v22, %v1024_v21  ;;  %v1965_v24 = vpop.f32.mrb[36].mxu0 }
 0x2bb   : > { %v978_v25 = vadd.f32 %v1965_v24, %v2390_v13  ;;  %v969_v26 = vpop.f32.mrb[37].mxu0 }
 0x2bc   : > { %v970_v27 = vadd.f32 %v969_v26, %v2390_v13  ;;  %v1966_v28 = vpop.f32.mrb[38].mxu0  ;;  %1999 = vmatprep.mubr.bf16.mxu1 %v1044_v23 }
 0x2bd   : > { %v981_v29 = vadd.f32 %v1966_v28, %v2390_v13  ;;  %v972_v30 = vpop.f32.mrb[39].mxu0  ;;  %2000 = vmatmul.mubr.bf16.gmra.mrb[28].mxu1 %v1045_v10  ;;  %v1030_v32 = vmax.f32 %v978_v25, 0.0 }
 0x2be   : > { %v973_v31 = vadd.f32 %v972_v30, %v2390_v13  ;;  %v1028_v33 = vmax.f32 %v970_v27, 0.0 }
 0x2bf   : > { %v1031_v11 = vmax.f32 %v981_v29, 0.0 }
 0x2c0   : > { %v1029_v34 = vmax.f32 %v973_v31, 0.0 }
 0x2c1   : > { %v1047_v35 = vpack.c.bf16 %v1031_v11, %v1030_v32 }
 0x2c2   : > { %v1046_v36 = vpack.c.bf16 %v1029_v34, %v1028_v33  ;;  %v1969_v37 = vpop.f32.mrb[40].mxu0 }
 0x2c3   : > { %v994_v38 = vadd.f32 %v1969_v37, %v2390_v13  ;;  %v985_v39 = vpop.f32.mrb[41].mxu0 }
 0x2c4   : > { %v986_v45 = vadd.f32 %v985_v39, %v2390_v13  ;;  %v1970_v46 = vpop.f32.mrb[42].mxu0  ;;  %2003 = vmatprep.mubr.bf16.mxu1 %v1046_v36 }
 0x2c5   : > { %v997_v47 = vadd.f32 %v1970_v46, %v2390_v13  ;;  %v988_v48 = vpop.f32.mrb[43].mxu0  ;;  %2004 = vmatmul.mubr.bf16.gmra.mrb[32].mxu1 %v1047_v35  ;;  %v1034_v50 = vmax.f32 %v994_v38, 0.0 }
 0x2c6   : > { %v989_v49 = vadd.f32 %v988_v48, %v2390_v13  ;;  %v1032_v52 = vmax.f32 %v986_v45, 0.0 }
 0x2c7   : > { %v1035_v51 = vmax.f32 %v997_v47, 0.0 }
 0x2c8   : > { %v1033_v53 = vmax.f32 %v989_v49, 0.0 }
 0x2c9   : > { %v1049_v54 = vpack.c.bf16 %v1035_v51, %v1034_v50 }
 0x2ca   : > { %v1048_v55 = vpack.c.bf16 %v1033_v53, %v1032_v52  ;;  %v1973_v56 = vpop.f32.mrb[44].mxu0 }
 0x2cb   : > { %v1010_v57 = vadd.f32 %v1973_v56, %v2390_v13  ;;  %v1001_v58 = vpop.f32.mrb[45].mxu0 }
 0x2cc   : > { %v1002_v43 = vadd.f32 %v1001_v58, %v2390_v13  ;;  %v1974_v59 = vpop.f32.mrb[46].mxu0  ;;  %2007 = vmatprep.mubr.bf16.mxu1 %v1048_v55 }
 0x2cd   : > { %v1013_v60 = vadd.f32 %v1974_v59, %v2390_v13  ;;  %v1004_v61 = vpop.f32.mrb[47].mxu0  ;;  %2008 = vmatmul.mubr.bf16.gmra.mrb[36].mxu1 %v1049_v54  ;;  %v1038_v63 = vmax.f32 %v1010_v57, 0.0 }
 0x2ce   : > { %v1005_v62 = vadd.f32 %v1004_v61, %v2390_v13  ;;  %v1036_v1 = vmax.f32 %v1002_v43, 0.0 }
 0x2cf   : > { %v1039_v0 = vmax.f32 %v1013_v60, 0.0 }
 0x2d0   : > { %v1037_v2 = vmax.f32 %v1005_v62, 0.0 }
 0x2d1   : > { %v1051_v3 = vpack.c.bf16 %v1039_v0, %v1038_v63 }
 0x2d2   : > { %v1050_v4 = vpack.c.bf16 %v1037_v2, %v1036_v1 }
 0x2d4   : > { %2011 = vmatprep.mubr.bf16.mxu1 %v1050_v4 }
 0x2d5   : > { %2012 = vmatmul.mubr.bf16.gmra.mrb[40].mxu1 %v1051_v3 }
 0x380   : > { %v1993_v44 = vpop.f32.mrb[48].mxu0 }
 0x381   : > { %v2427_v13 = vadd.f32 %v1993_v44, %v2424_v6  ;;  %v1154_v7 = vpop.f32.mrb[49].mxu0 }
 0x382   : > { %v2430_v8 = vadd.f32 %v1154_v7, %v2424_v6  ;;  %v1994_v14 = vpop.f32.mrb[50].mxu0 }
 0x383   : > { %v2433_v15 = vadd.f32 %v1994_v14, %v2424_v6  ;;  %v1157_v16 = vpop.f32.mrb[51].mxu0  ;;  %v1256_v17 = vsel %vm1249_vm2, %v2427_v13, 0.0 }
 0x384   : > { %v2438_v42 = vadd.f32 %v1157_v16, %v2424_v6  ;;  %1257 = vadd.xlane.f32.xlu1 %v1256_v17  ;;  %v1250_v18 = vsel %vm1249_vm2, %v2430_v8, 0.0 }
 0x385   : > { %1251 = vadd.xlane.f32.xlu0 %v1250_v18  ;;  %v1259_v9 = vsel %vm1249_vm2, %v2433_v15, 0.0 }
 0x386   : > { %v1253_v20 = vsel %vm1249_vm2, %v2438_v42, 0.0 }
 0x388   : > { %v1997_v19 = vpop.f32.mrb[24].mxu1  ;;  %1260 = vadd.xlane.f32.xlu1 %v1259_v9 }
 0x389   : > { %v2447_v21 = vadd.f32 %v1997_v19, %v2424_v6  ;;  %v1170_v22 = vpop.f32.mrb[25].mxu1  ;;  %1254 = vadd.xlane.f32.xlu0 %v1253_v20 }
 0x38a   : > { %v1998_v10 = vpop.f32.mrb[26].mxu1  ;;  %v2455_v26 = vadd.f32 %v1170_v22, %v2424_v6 }
 0x38b   : > { %v2450_v23 = vadd.f32 %v1998_v10, %v2424_v6  ;;  %v1173_v24 = vpop.f32.mrb[27].mxu1  ;;  %v1268_v25 = vsel %vm1249_vm2, %v2447_v21, 0.0 }
 0x38c   : > { %v2458_v27 = vadd.f32 %v1173_v24, %v2424_v6  ;;  %v1262_v30 = vsel %vm1249_vm2, %v2455_v26, 0.0 }
 0x38d   : > { %1269 = vadd.xlane.f32.xlu0 %v1268_v25  ;;  %v1271_v28 = vsel %vm1249_vm2, %v2450_v23, 0.0 }
 0x38e   : > { %1272 = vadd.xlane.f32.xlu1 %v1271_v28  ;;  %v1265_v11 = vsel %vm1249_vm2, %v2458_v27, 0.0 }
 0x390   : > { %v2001_v29 = vpop.f32.mrb[28].mxu1 }
 0x391   : > { %v2465_v31 = vadd.f32 %v2001_v29, %v2424_v6  ;;  %v1186_v32 = vpop.f32.mrb[29].mxu1  ;;  %1263 = vadd.xlane.f32.xlu0 %v1262_v30 }
 0x392   : > { %v2002_v33 = vpop.f32.mrb[30].mxu1  ;;  %1266 = vadd.xlane.f32.xlu1 %v1265_v11  ;;  %v2475_v37 = vadd.f32 %v1186_v32, %v2424_v6 }
 0x393   : > { %v2470_v34 = vadd.f32 %v2002_v33, %v2424_v6  ;;  %v1189_v35 = vpop.f32.mrb[31].mxu1  ;;  %v1280_v36 = vsel %vm1249_vm2, %v2465_v31, 0.0 }
 0x394   : > { %v2478_v38 = vadd.f32 %v1189_v35, %v2424_v6  ;;  %v1274_v46 = vsel %vm1249_vm2, %v2475_v37, 0.0 }
 0x395   : > { %1281 = vadd.xlane.f32.xlu0 %v1280_v36  ;;  %v1283_v39 = vsel %vm1249_vm2, %v2470_v34, 0.0 }
 0x396   : > { %1284 = vadd.xlane.f32.xlu1 %v1283_v39  ;;  %v1277_v49 = vsel %vm1249_vm2, %v2478_v38, 0.0 }
 0x398   : > { %v2005_v45 = vpop.f32.mrb[32].mxu1 }
 0x399   : > { %v2485_v47 = vadd.f32 %v2005_v45, %v2424_v6  ;;  %v1202_v48 = vpop.f32.mrb[33].mxu1  ;;  %1275 = vadd.xlane.f32.xlu0 %v1274_v46 }
 0x39a   : > { %v2006_v50 = vpop.f32.mrb[34].mxu1  ;;  %1278 = vadd.xlane.f32.xlu1 %v1277_v49  ;;  %v2495_v54 = vadd.f32 %v1202_v48, %v2424_v6 }
 0x39b   : > { %v2490_v51 = vadd.f32 %v2006_v50, %v2424_v6  ;;  %v1205_v52 = vpop.f32.mrb[35].mxu1  ;;  %v1292_v53 = vsel %vm1249_vm2, %v2485_v47, 0.0 }
 0x39c   : > { %v2498_v55 = vadd.f32 %v1205_v52, %v2424_v6  ;;  %v1286_v58 = vsel %vm1249_vm2, %v2495_v54, 0.0 }
 0x39d   : > { %1293 = vadd.xlane.f32.xlu0 %v1292_v53  ;;  %v1295_v56 = vsel %vm1249_vm2, %v2490_v51, 0.0 }
 0x39e   : > { %1296 = vadd.xlane.f32.xlu1 %v1295_v56  ;;  %v1289_v60 = vsel %vm1249_vm2, %v2498_v55, 0.0 }
 0x3a0   : > { %v2009_v57 = vpop.f32.mrb[36].mxu1 }
 0x3a1   : > { %v2505_v43 = vadd.f32 %v2009_v57, %v2424_v6  ;;  %v1218_v59 = vpop.f32.mrb[37].mxu1  ;;  %1287 = vadd.xlane.f32.xlu0 %v1286_v58 }
 0x3a2   : > { %v2010_v61 = vpop.f32.mrb[38].mxu1  ;;  %1290 = vadd.xlane.f32.xlu1 %v1289_v60  ;;  %v2515_v1 = vadd.f32 %v1218_v59, %v2424_v6 }
 0x3a3   : > { %v2510_v62 = vadd.f32 %v2010_v61, %v2424_v6  ;;  %v1221_v63 = vpop.f32.mrb[39].mxu1  ;;  %v1304_v0 = vsel %vm1249_vm2, %v2505_v43, 0.0 }
 0x3a4   : > { %v2518_v2 = vadd.f32 %v1221_v63, %v2424_v6  ;;  %v1298_v44 = vsel %vm1249_vm2, %v2515_v1, 0.0 }
 0x3a5   : > { %1305 = vadd.xlane.f32.xlu0 %v1304_v0  ;;  %v1307_v3 = vsel %vm1249_vm2, %v2510_v62, 0.0 }
 0x3a6   : > { %1308 = vadd.xlane.f32.xlu1 %v1307_v3  ;;  %v1301_v14 = vsel %vm1249_vm2, %v2518_v2, 0.0 }
 0x3a8   : > { %v2013_v4 = vpop.f32.mrb[40].mxu1 }
 0x3a9   : > { %v1234_v7 = vpop.f32.mrb[41].mxu1  ;;  %1299 = vadd.xlane.f32.xlu0 %v1298_v44  ;;  %v2530_v9 = vadd.f32 %v2013_v4, %v2424_v6 }
 0x3aa   : > { %v2527_v16 = vadd.f32 %v1234_v7, %v2424_v6  ;;  %v2014_v17 = vpop.f32.mrb[42].mxu1  ;;  %1302 = vadd.xlane.f32.xlu1 %v1301_v14 }
 0x3ab   : > { %v1237_v18 = vpop.f32.mrb[43].mxu1  ;;  %v2538_v22 = vadd.f32 %v2014_v17, %v2424_v6  ;;  %v1316_v24 = vsel %vm1249_vm2, %v2530_v9, 0.0 }
 0x3ac   : > { %v2533_v19 = vadd.f32 %v1237_v18, %v2424_v6  ;;  %v1310_v20 = vsel %vm1249_vm2, %v2527_v16, 0.0 }
 0x3ad   : > { %1311 = vadd.xlane.f32.xlu0 %v1310_v20  ;;  %v1319_v25 = vsel %vm1249_vm2, %v2538_v22, 0.0 }
 0x3ae   : > { %v1313_v10 = vsel %vm1249_vm2, %v2533_v19, 0.0 }
 0x3af   : > { %1314 = vadd.xlane.f32.xlu1 %v1313_v10 }
 0x3b1   : > { %1317 = vadd.xlane.f32.xlu0 %v1316_v24 }
 0x3b3   : > { %1320 = vadd.xlane.f32.xlu1 %v1319_v25 }
 0x411   : > { %v1258_v28 = vpop.xlane.xlu1 %1257 }
 0x412   : > { %v1324_v29 = vmul.f32 0.03125, %v1258_v28  ;;  %v1252_v30 = vpop.xlane.xlu0 %1251 }
 0x413   : > { %v1322_v32 = vmul.f32 0.03125, %v1252_v30 }
 0x414   : > { %v2547_v11 = vsub.f32 %v2427_v13, %v1324_v29 }
 0x415   : > { %v2550_v6 = vsub.f32 %v2430_v8, %v1322_v32  ;;  %v1261_v33 = vpop.xlane.xlu1 %1260 }
 0x416   : > { %v1325_v35 = vmul.f32 0.03125, %v1261_v33  ;;  %v1255_v36 = vpop.xlane.xlu0 %1254  ;;  %v1372_v39 = vmul.f32 %v2547_v11, %v2547_v11 }
 0x417   : > { %v1323_v45 = vmul.f32 0.03125, %v1255_v36  ;;  %v1370_v49 = vmul.f32 %v2550_v6, %v2550_v6 }
 0x418   : > { %v2555_v46 = vsub.f32 %v2433_v15, %v1325_v35  ;;  %v1400_v48 = vsel %vm1249_vm2, %v1372_v39, 0.0 }
 0x419   : > { %v2561_v13 = vsub.f32 %v2438_v42, %v1323_v45  ;;  %1401 = vadd.xlane.f32.xlu0 %v1400_v48  ;;  %v1394_v15 = vsel %vm1249_vm2, %v1370_v49, 0.0 }
 0x41a   : > { %v1270_v8 = vpop.xlane.xlu0 %1269  ;;  %v1373_v50 = vmul.f32 %v2555_v46, %v2555_v46 }
 0x41b   : > { %v1328_v52 = vmul.f32 0.03125, %v1270_v8  ;;  %v1273_v53 = vpop.xlane.xlu1 %1272  ;;  %v1371_v58 = vmul.f32 %v2561_v13, %v2561_v13 }
 0x41c   : > { %v1329_v56 = vmul.f32 0.03125, %v1273_v53  ;;  %v1403_v57 = vsel %vm1249_vm2, %v1373_v50, 0.0 }
 0x41d   : > { %v2570_v59 = vsub.f32 %v2447_v21, %v1328_v52  ;;  %1404 = vadd.xlane.f32.xlu1 %v1403_v57  ;;  %1395 = vadd.xlane.f32.xlu0 %v1394_v15  ;;  %v1397_v4 = vsel %vm1249_vm2, %v1371_v58, 0.0 }
 0x41e   : > { %v2573_v42 = vsub.f32 %v2450_v23, %v1329_v56  ;;  %v1264_v60 = vpop.xlane.xlu0 %1263 }
 0x41f   : > { %v1326_v61 = vmul.f32 0.03125, %v1264_v60  ;;  %v1267_v63 = vpop.xlane.xlu1 %1266  ;;  %v1376_v0 = vmul.f32 %v2570_v59, %v2570_v59 }
 0x420   : > { %v1327_v3 = vmul.f32 0.03125, %v1267_v63  ;;  %v1377_v44 = vmul.f32 %v2573_v42, %v2573_v42 }
 0x421   : > { %v2581_v21 = vsub.f32 %v2455_v26, %v1326_v61  ;;  %1398 = vadd.xlane.f32.xlu1 %v1397_v4  ;;  %v1412_v7 = vsel %vm1249_vm2, %v1376_v0, 0.0 }
 0x422   : > { %v2585_v23 = vsub.f32 %v2458_v27, %v1327_v3  ;;  %1413 = vadd.xlane.f32.xlu0 %v1412_v7  ;;  %v1282_v14 = vpop.xlane.xlu0 %1281  ;;  %v1415_v24 = vsel %vm1249_vm2, %v1377_v44, 0.0 }
 0x423   : > { %v1332_v17 = vmul.f32 0.03125, %v1282_v14  ;;  %v1285_v18 = vpop.xlane.xlu1 %1284  ;;  %v1374_v20 = vmul.f32 %v2581_v21, %v2581_v21 }
 0x424   : > { %v1333_v10 = vmul.f32 0.03125, %v1285_v18  ;;  %v1375_v26 = vmul.f32 %v2585_v23, %v2585_v23 }
 0x425   : > { %v2593_v25 = vsub.f32 %v2465_v31, %v1332_v17  ;;  %1416 = vadd.xlane.f32.xlu1 %v1415_v24  ;;  %v1406_v27 = vsel %vm1249_vm2, %v1374_v20, 0.0 }
 0x426   : > { %v2597_v28 = vsub.f32 %v2470_v34, %v1333_v10  ;;  %1407 = vadd.xlane.f32.xlu0 %v1406_v27  ;;  %v1276_v29 = vpop.xlane.xlu0 %1275  ;;  %v1409_v36 = vsel %vm1249_vm2, %v1375_v26, 0.0 }
 0x427   : > { %v1330_v30 = vmul.f32 0.03125, %v1276_v29  ;;  %v1279_v32 = vpop.xlane.xlu1 %1278  ;;  %v1380_v33 = vmul.f32 %v2593_v25, %v2593_v25 }
 0x428   : > { %v1331_v35 = vmul.f32 0.03125, %v1279_v32  ;;  %v1381_v31 = vmul.f32 %v2597_v28, %v2597_v28 }
 0x429   : > { %v2605_v39 = vsub.f32 %v2475_v37, %v1330_v30  ;;  %1410 = vadd.xlane.f32.xlu1 %v1409_v36  ;;  %v1424_v34 = vsel %vm1249_vm2, %v1380_v33, 0.0 }
 0x42a   : > { %v2609_v45 = vsub.f32 %v2478_v38, %v1331_v35  ;;  %1425 = vadd.xlane.f32.xlu0 %v1424_v34  ;;  %v1294_v48 = vpop.xlane.xlu0 %1293  ;;  %v1427_v53 = vsel %vm1249_vm2, %v1381_v31, 0.0 }
 0x42b   : > { %v1336_v49 = vmul.f32 0.03125, %v1294_v48  ;;  %v1297_v8 = vpop.xlane.xlu1 %1296  ;;  %v1378_v50 = vmul.f32 %v2605_v39, %v2605_v39 }
 0x42c   : > { %v1337_v52 = vmul.f32 0.03125, %v1297_v8  ;;  %v1379_v37 = vmul.f32 %v2609_v45, %v2609_v45 }
 0x42d   : > { %v2617_v56 = vsub.f32 %v2485_v47, %v1336_v49  ;;  %1428 = vadd.xlane.f32.xlu1 %v1427_v53  ;;  %v1418_v38 = vsel %vm1249_vm2, %v1378_v50, 0.0 }
 0x42e   : > { %v2621_v57 = vsub.f32 %v2490_v51, %v1337_v52  ;;  %1419 = vadd.xlane.f32.xlu0 %v1418_v38  ;;  %v1288_v15 = vpop.xlane.xlu0 %1287  ;;  %v1421_v0 = vsel %vm1249_vm2, %v1379_v37, 0.0 }
 0x42f   : > { %v1334_v58 = vmul.f32 0.03125, %v1288_v15  ;;  %v1291_v60 = vpop.xlane.xlu1 %1290  ;;  %v1384_v61 = vmul.f32 %v2617_v56, %v2617_v56 }
 0x430   : > { %v1335_v63 = vmul.f32 0.03125, %v1291_v60  ;;  %v1385_v47 = vmul.f32 %v2621_v57, %v2621_v57 }
 0x431   : > { %v2629_v3 = vsub.f32 %v2495_v54, %v1334_v58  ;;  %1422 = vadd.xlane.f32.xlu1 %v1421_v0  ;;  %v1436_v51 = vsel %vm1249_vm2, %v1384_v61, 0.0 }
 0x432   : > { %v2633_v4 = vsub.f32 %v2498_v55, %v1335_v63  ;;  %1437 = vadd.xlane.f32.xlu0 %v1436_v51  ;;  %v1306_v44 = vpop.xlane.xlu0 %1305  ;;  %v1439_v20 = vsel %vm1249_vm2, %v1385_v47, 0.0 }
 0x433   : > { %v1340_v7 = vmul.f32 0.03125, %v1306_v44  ;;  %v1309_v14 = vpop.xlane.xlu1 %1308  ;;  %v1382_v17 = vmul.f32 %v2629_v3, %v2629_v3 }
 0x434   : > { %v1341_v18 = vmul.f32 0.03125, %v1309_v14  ;;  %v1383_v54 = vmul.f32 %v2633_v4, %v2633_v4 }
 0x435   : > { %v2641_v10 = vsub.f32 %v2505_v43, %v1340_v7  ;;  %1440 = vadd.xlane.f32.xlu1 %v1439_v20  ;;  %v1430_v55 = vsel %vm1249_vm2, %v1382_v17, 0.0 }
 0x436   : > { %v2645_v24 = vsub.f32 %v2510_v62, %v1341_v18  ;;  %1431 = vadd.xlane.f32.xlu0 %v1430_v55  ;;  %v1300_v26 = vpop.xlane.xlu0 %1299  ;;  %v1433_v33 = vsel %vm1249_vm2, %v1383_v54, 0.0 }
 0x437   : > { %v1338_v27 = vmul.f32 0.03125, %v1300_v26  ;;  %v1303_v29 = vpop.xlane.xlu1 %1302  ;;  %v1388_v30 = vmul.f32 %v2641_v10, %v2641_v10 }
 0x438   : > { %v1339_v32 = vmul.f32 0.03125, %v1303_v29  ;;  %v1389_v43 = vmul.f32 %v2645_v24, %v2645_v24 }
 0x439   : > { %v2653_v35 = vsub.f32 %v2515_v1, %v1338_v27  ;;  %1434 = vadd.xlane.f32.xlu1 %v1433_v33  ;;  %v1448_v62 = vsel %vm1249_vm2, %v1388_v30, 0.0 }
 0x43a   : > { %v2657_v36 = vsub.f32 %v2518_v2, %v1339_v32  ;;  %1449 = vadd.xlane.f32.xlu0 %v1448_v62  ;;  %v1312_v31 = vpop.xlane.xlu0 %1311  ;;  %v1451_v8 = vsel %vm1249_vm2, %v1389_v43, 0.0 }
 0x43b   : > { %v1342_v34 = vmul.f32 0.03125, %v1312_v31  ;;  %v1386_v48 = vmul.f32 %v2653_v35, %v2653_v35 }
 0x43c   : > { %v1315_v49 = vpop.xlane.xlu1 %1314  ;;  %v1387_v50 = vmul.f32 %v2657_v36, %v2657_v36 }
 0x43d   : > { %v2665_v1 = vsub.f32 %v2527_v16, %v1342_v34  ;;  %v1343_v52 = vmul.f32 0.03125, %v1315_v49  ;;  %1452 = vadd.xlane.f32.xlu1 %v1451_v8  ;;  %v1442_v2 = vsel %vm1249_vm2, %v1386_v48, 0.0  ;;  %v2693_v49 = vrot.slane %v2419_v5, %v603_v12 }
 0x43e   : > { %1443 = vadd.xlane.f32.xlu0 %v1442_v2  ;;  %v1318_v53 = vpop.xlane.xlu0 %1317  ;;  %v1445_v60 = vsel %vm1249_vm2, %v1387_v50, 0.0  ;;  %v2698_v2 = vrot.slane %v2419_v5, %v837_v40 }
 0x43f   : > { %v2669_v37 = vsub.f32 %v2533_v19, %v1343_v52  ;;  %v1344_v38 = vmul.f32 0.03125, %v1318_v53  ;;  %v1390_v15 = vmul.f32 %v2665_v1, %v2665_v1 }
 0x440   : > { %v1321_v58 = vpop.xlane.xlu1 %1320 }
 0x441   : > { %v2675_v61 = vsub.f32 %v2530_v9, %v1344_v38  ;;  %v1345_v16 = vmul.f32 0.03125, %v1321_v58  ;;  %1446 = vadd.xlane.f32.xlu1 %v1445_v60  ;;  %v1454_v63 = vsel %vm1249_vm2, %v1390_v15, 0.0  ;;  %v1391_v0 = vmul.f32 %v2669_v37, %v2669_v37 }
 0x442   : > { %1455 = vadd.xlane.f32.xlu0 %v1454_v63 }
 0x443   : > { %v2681_v19 = vsub.f32 %v2538_v22, %v1345_v16  ;;  %v1457_v47 = vsel %vm1249_vm2, %v1391_v0, 0.0  ;;  %v1392_v51 = vmul.f32 %v2675_v61, %v2675_v61 }
 0x445   : > { %1458 = vadd.xlane.f32.xlu1 %v1457_v47  ;;  %v1460_v9 = vsel %vm1249_vm2, %v1392_v51, 0.0  ;;  %v1393_v44 = vmul.f32 %v2681_v19, %v2681_v19 }
 0x446   : > { %1461 = vadd.xlane.f32.xlu0 %v1460_v9 }
 0x447   : > { %v1463_v7 = vsel %vm1249_vm2, %v1393_v44, 0.0 }
 0x449   : > { %1464 = vadd.xlane.f32.xlu1 %v1463_v7 }
 0x4a6   : > { %v1402_v14 = vpop.xlane.xlu0 %1401 }
 0x4a7   : > { %v1468_v17 = vmul.f32 0.03125, %v1402_v14 }
 0x4a9   : > { %v1492_v18 = vadd.f32 1e-05, %v1468_v17 }
 0x4aa   : > { %v1405_v22 = vpop.xlane.xlu1 %1404  ;;  %v1396_v20 = vpop.xlane.xlu0 %1395 }
 0x4ab   : > { %2063 = vrsqrt.f32 %v1492_v18  ;;  %v1469_v54 = vmul.f32 0.03125, %v1405_v22  ;;  %v1466_v55 = vmul.f32 0.03125, %v1396_v20 }
 0x4ad   : > { %v1493_v26 = vadd.f32 1e-05, %v1469_v54  ;;  %v1490_v27 = vadd.f32 1e-05, %v1466_v55 }
 0x4ae   : > { %v1399_v29 = vpop.xlane.xlu1 %1398 }
 0x4af   : > { %2065 = vrsqrt.f32 %v1493_v26  ;;  %v1467_v30 = vmul.f32 0.03125, %v1399_v29  ;;  %v1414_v32 = vpop.xlane.xlu0 %1413 }
 0x4b0   : > { %2067 = vrsqrt.f32 %v1490_v27  ;;  %v1472_v33 = vmul.f32 0.03125, %v1414_v32 }
 0x4b1   : > { %v1491_v43 = vadd.f32 1e-05, %v1467_v30 }
 0x4b2   : > { %v1496_v62 = vadd.f32 1e-05, %v1472_v33  ;;  %v1417_v31 = vpop.xlane.xlu1 %1416 }
 0x4b3   : > { %2069 = vrsqrt.f32 %v1491_v43  ;;  %v1473_v34 = vmul.f32 0.03125, %v1417_v31  ;;  %v1408_v48 = vpop.xlane.xlu0 %1407 }
 0x4b4   : > { %2071 = vrsqrt.f32 %v1496_v62  ;;  %v1470_v8 = vmul.f32 0.03125, %v1408_v48 }
 0x4b5   : > { %v2064_v50 = vpop.eup %2063  ;;  %v1497_v52 = vadd.f32 1e-05, %v1473_v34 }
 0x4b6   : > { %v1540_v53 = vmul.f32 %v2064_v50, %v2547_v11  ;;  %v1494_v38 = vadd.f32 1e-05, %v1470_v8  ;;  %v1411_v15 = vpop.xlane.xlu1 %1410 }
 0x4b7   : > { %2073 = vrsqrt.f32 %v1497_v52  ;;  %v1471_v58 = vmul.f32 0.03125, %v1411_v15  ;;  %v1426_v60 = vpop.xlane.xlu0 %1425 }
 0x4b8   : > { %v1568_v12 = vmul.f32 %v2693_v49, %v1540_v53  ;;  %2075 = vrsqrt.f32 %v1494_v38  ;;  %v1476_v16 = vmul.f32 0.03125, %v1426_v60 }
 0x4b9   : > { %v2066_v63 = vpop.eup %2065  ;;  %v1495_v41 = vadd.f32 1e-05, %v1471_v58 }
 0x4ba   : > { %v2068_v40 = vpop.eup %2067  ;;  %v1596_v5 = vadd.f32 %v2698_v2, %v1568_v12  ;;  %v1541_v11 = vmul.f32 %v2066_v63, %v2555_v46  ;;  %v1500_v0 = vadd.f32 1e-05, %v1476_v16  ;;  %v1429_v47 = vpop.xlane.xlu1 %1428 }
 0x4bb   : > { %v1538_v51 = vmul.f32 %v2068_v40, %v2550_v6  ;;  %2077 = vrsqrt.f32 %v1495_v41  ;;  %v1477_v9 = vmul.f32 0.03125, %v1429_v47  ;;  %v1420_v44 = vpop.xlane.xlu0 %1419 }
 0x4bc   : > { %1620 = vst.msk [vmem:[%s2707_s18 + $0x10] sm:$0xff] %vm1249_vm2, %v1596_v5  ;;  %v1569_v7 = vmul.f32 %v2693_v49, %v1541_v11  ;;  %2079 = vrsqrt.f32 %v1500_v0  ;;  %v1474_v14 = vmul.f32 0.03125, %v1420_v44 }
 0x4bd   : > { %v2070_v17 = vpop.eup %2069  ;;  %v1566_v18 = vmul.f32 %v2693_v49, %v1538_v51  ;;  %v1501_v22 = vadd.f32 1e-05, %v1477_v9 }
 0x4be   : > { %v2072_v46 = vpop.eup %2071  ;;  %v1597_v20 = vadd.f32 %v2698_v2, %v1569_v7  ;;  %v1539_v6 = vmul.f32 %v2070_v17, %v2561_v13  ;;  %v1498_v54 = vadd.f32 1e-05, %v1474_v14  ;;  %v1423_v55 = vpop.xlane.xlu1 %1422 }
 0x4bf   : > { %v1594_v26 = vadd.f32 %v2698_v2, %v1566_v18  ;;  %v1544_v27 = vmul.f32 %v2072_v46, %v2570_v59  ;;  %2081 = vrsqrt.f32 %v1501_v22  ;;  %v1475_v29 = vmul.f32 0.03125, %v1423_v55  ;;  %v1438_v30 = vpop.xlane.xlu0 %1437 }
 0x4c0   : > { %1621 = vst.msk [vmem:[%s2707_s18 + $0x18] sm:$0xff] %vm1249_vm2, %v1597_v20  ;;  %v1567_v32 = vmul.f32 %v2693_v49, %v1539_v6  ;;  %2083 = vrsqrt.f32 %v1498_v54  ;;  %v1480_v33 = vmul.f32 0.03125, %v1438_v30 }
 0x4c1   : > { %v2074_v43 = vpop.eup %2073  ;;  %1618 = vst.msk [vmem:[%s2707_s18] sm:$0xff] %vm1249_vm2, %v1594_v26  ;;  %v1572_v13 = vmul.f32 %v2693_v49, %v1544_v27  ;;  %v1499_v62 = vadd.f32 1e-05, %v1475_v29 }
 0x4c2   : > { %v2076_v31 = vpop.eup %2075  ;;  %v1595_v59 = vadd.f32 %v2698_v2, %v1567_v32  ;;  %v1545_v34 = vmul.f32 %v2074_v43, %v2573_v42  ;;  %v1504_v48 = vadd.f32 1e-05, %v1480_v33  ;;  %v1441_v8 = vpop.xlane.xlu1 %1440 }
 0x4c3   : > { %v1600_v50 = vadd.f32 %v2698_v2, %v1572_v13  ;;  %v1542_v52 = vmul.f32 %v2076_v31, %v2581_v21  ;;  %2085 = vrsqrt.f32 %v1499_v62  ;;  %v1481_v53 = vmul.f32 0.03125, %v1441_v8  ;;  %v1432_v38 = vpop.xlane.xlu0 %1431 }
 0x4c4   : > { %1619 = vst.msk [vmem:[%s2707_s18 + $0x8] sm:$0xff] %vm1249_vm2, %v1595_v59  ;;  %v1573_v15 = vmul.f32 %v2693_v49, %v1545_v34  ;;  %2087 = vrsqrt.f32 %v1504_v48  ;;  %v1478_v58 = vmul.f32 0.03125, %v1432_v38 }
 0x4c5   : > { %v2078_v60 = vpop.eup %2077  ;;  %1624 = vst.msk [vmem:[%s2707_s18 + $0x30] sm:$0xff] %vm1249_vm2, %v1600_v50  ;;  %v1570_v42 = vmul.f32 %v2693_v49, %v1542_v52  ;;  %v1505_v12 = vadd.f32 1e-05, %v1481_v53 }
 0x4c6   : > { %v2080_v16 = vpop.eup %2079  ;;  %v1601_v21 = vadd.f32 %v2698_v2, %v1573_v15  ;;  %v1543_v63 = vmul.f32 %v2078_v60, %v2585_v23  ;;  %v1502_v41 = vadd.f32 1e-05, %v1478_v58  ;;  %v1435_v40 = vpop.xlane.xlu1 %1434 }
 0x4c7   : > { %v1598_v5 = vadd.f32 %v2698_v2, %v1570_v42  ;;  %v1548_v11 = vmul.f32 %v2080_v16, %v2593_v25  ;;  %2089 = vrsqrt.f32 %v1505_v12  ;;  %v1479_v0 = vmul.f32 0.03125, %v1435_v40  ;;  %v1450_v47 = vpop.xlane.xlu0 %1449 }
 0x4c8   : > { %1625 = vst.msk [vmem:[%s2707_s18 + $0x38] sm:$0xff] %vm1249_vm2, %v1601_v21  ;;  %v1571_v51 = vmul.f32 %v2693_v49, %v1543_v63  ;;  %2091 = vrsqrt.f32 %v1502_v41  ;;  %v1484_v9 = vmul.f32 0.03125, %v1450_v47 }
 0x4c9   : > { %v2082_v44 = vpop.eup %2081  ;;  %1622 = vst.msk [vmem:[%s2707_s18 + $0x20] sm:$0xff] %vm1249_vm2, %v1598_v5  ;;  %v1576_v23 = vmul.f32 %v2693_v49, %v1548_v11  ;;  %v1503_v7 = vadd.f32 1e-05, %v1479_v0 }
 0x4ca   : > { %v2084_v14 = vpop.eup %2083  ;;  %v1599_v25 = vadd.f32 %v2698_v2, %v1571_v51  ;;  %v1549_v17 = vmul.f32 %v2082_v44, %v2597_v28  ;;  %v1508_v18 = vadd.f32 1e-05, %v1484_v9  ;;  %v1453_v22 = vpop.xlane.xlu1 %1452 }
 0x4cb   : > { %v1604_v46 = vadd.f32 %v2698_v2, %v1576_v23  ;;  %v1546_v20 = vmul.f32 %v2084_v14, %v2605_v39  ;;  %2093 = vrsqrt.f32 %v1503_v7  ;;  %v1485_v6 = vmul.f32 0.03125, %v1453_v22  ;;  %v1444_v54 = vpop.xlane.xlu0 %1443 }
 0x4cc   : > { %1623 = vst.msk [vmem:[%s2707_s18 + $0x28] sm:$0xff] %vm1249_vm2, %v1599_v25  ;;  %v1577_v55 = vmul.f32 %v2693_v49, %v1549_v17  ;;  %2095 = vrsqrt.f32 %v1508_v18  ;;  %v1482_v26 = vmul.f32 0.03125, %v1444_v54 }
 0x4cd   : > { %v2086_v27 = vpop.eup %2085  ;;  %1628 = vst.msk [vmem:[%s2707_s18 + $0x50] sm:$0xff] %vm1249_vm2, %v1604_v46  ;;  %v1574_v28 = vmul.f32 %v2693_v49, %v1546_v20  ;;  %v1509_v29 = vadd.f32 1e-05, %v1485_v6 }
 0x4ce   : > { %v2088_v30 = vpop.eup %2087  ;;  %v1605_v39 = vadd.f32 %v2698_v2, %v1577_v55  ;;  %v1547_v32 = vmul.f32 %v2086_v27, %v2609_v45  ;;  %v1506_v33 = vadd.f32 1e-05, %v1482_v26  ;;  %v1447_v43 = vpop.xlane.xlu1 %1446 }
 0x4cf   : > { %v1602_v13 = vadd.f32 %v2698_v2, %v1574_v28  ;;  %v1552_v62 = vmul.f32 %v2088_v30, %v2617_v56  ;;  %2097 = vrsqrt.f32 %v1509_v29  ;;  %v1483_v31 = vmul.f32 0.03125, %v1447_v43  ;;  %v1456_v59 = vpop.xlane.xlu0 %1455 }
 0x4d0   : > { %1629 = vst.msk [vmem:[%s2707_s18 + $0x58] sm:$0xff] %vm1249_vm2, %v1605_v39  ;;  %v1575_v34 = vmul.f32 %v2693_v49, %v1547_v32  ;;  %2099 = vrsqrt.f32 %v1506_v33  ;;  %v1486_v48 = vmul.f32 0.03125, %v1456_v59 }
 0x4d1   : > { %v2090_v8 = vpop.eup %2089  ;;  %1626 = vst.msk [vmem:[%s2707_s18 + $0x40] sm:$0xff] %vm1249_vm2, %v1602_v13  ;;  %v1580_v45 = vmul.f32 %v2693_v49, %v1552_v62  ;;  %v1507_v50 = vadd.f32 1e-05, %v1483_v31 }
 0x4d2   : > { %v2092_v52 = vpop.eup %2091  ;;  %v1603_v56 = vadd.f32 %v2698_v2, %v1575_v34  ;;  %v1553_v53 = vmul.f32 %v2090_v8, %v2621_v57  ;;  %v1510_v38 = vadd.f32 1e-05, %v1486_v48  ;;  %v1459_v15 = vpop.xlane.xlu1 %1458 }
 0x4d3   : > { %v1608_v58 = vadd.f32 %v2698_v2, %v1580_v45  ;;  %v1550_v60 = vmul.f32 %v2092_v52, %v2629_v3  ;;  %2101 = vrsqrt.f32 %v1507_v50  ;;  %v1487_v42 = vmul.f32 0.03125, %v1459_v15  ;;  %v1462_v12 = vpop.xlane.xlu0 %1461 }
 0x4d4   : > { %1627 = vst.msk [vmem:[%s2707_s18 + $0x48] sm:$0xff] %vm1249_vm2, %v1603_v56  ;;  %v1581_v16 = vmul.f32 %v2693_v49, %v1553_v53  ;;  %2103 = vrsqrt.f32 %v1510_v38  ;;  %v1488_v21 = vmul.f32 0.03125, %v1462_v12 }
 0x4d5   : > { %v2094_v63 = vpop.eup %2093  ;;  %1632 = vst.msk [vmem:[%s2707_s18 + $0x70] sm:$0xff] %vm1249_vm2, %v1608_v58  ;;  %v1578_v57 = vmul.f32 %v2693_v49, %v1550_v60  ;;  %v1511_v41 = vadd.f32 1e-05, %v1487_v42 }
 0x4d6   : > { %v2096_v40 = vpop.eup %2095  ;;  %v1609_v3 = vadd.f32 %v2698_v2, %v1581_v16  ;;  %v1551_v5 = vmul.f32 %v2094_v63, %v2633_v4  ;;  %v1512_v11 = vadd.f32 1e-05, %v1488_v21  ;;  %v1465_v0 = vpop.xlane.xlu1 %1464 }
 0x4d7   : > { %v1606_v47 = vadd.f32 %v2698_v2, %v1578_v57  ;;  %v1556_v51 = vmul.f32 %v2096_v40, %v2641_v10  ;;  %2105 = vrsqrt.f32 %v1511_v41  ;;  %v1489_v9 = vmul.f32 0.03125, %v1465_v0 }
 0x4d8   : > { %1633 = vst.msk [vmem:[%s2707_s18 + $0x78] sm:$0xff] %vm1249_vm2, %v1609_v3  ;;  %v1579_v44 = vmul.f32 %v2693_v49, %v1551_v5  ;;  %2107 = vrsqrt.f32 %v1512_v11 }
 0x4d9   : > { %v2098_v23 = vpop.eup %2097  ;;  %1630 = vst.msk [vmem:[%s2707_s18 + $0x60] sm:$0xff] %vm1249_vm2, %v1606_v47  ;;  %v1584_v4 = vmul.f32 %v2693_v49, %v1556_v51  ;;  %v1513_v7 = vadd.f32 1e-05, %v1489_v9 }
 0x4da   : > { %v2100_v14 = vpop.eup %2099  ;;  %v1607_v25 = vadd.f32 %v2698_v2, %v1579_v44  ;;  %v1557_v10 = vmul.f32 %v2098_v23, %v2645_v24 }
 0x4db   : > { %v1612_v17 = vadd.f32 %v2698_v2, %v1584_v4  ;;  %v1554_v18 = vmul.f32 %v2100_v14, %v2653_v35  ;;  %2109 = vrsqrt.f32 %v1513_v7 }
 0x4dc   : > { %1631 = vst.msk [vmem:[%s2707_s18 + $0x68] sm:$0xff] %vm1249_vm2, %v1607_v25  ;;  %v1585_v22 = vmul.f32 %v2693_v49, %v1557_v10 }
 0x4dd   : > { %v2102_v46 = vpop.eup %2101  ;;  %1636 = vst.msk [vmem:[%s2707_s18 + $0x90] sm:$0xff] %vm1249_vm2, %v1612_v17  ;;  %v1582_v20 = vmul.f32 %v2693_v49, %v1554_v18 }
 0x4de   : > { %v2104_v6 = vpop.eup %2103  ;;  %v1613_v54 = vadd.f32 %v2698_v2, %v1585_v22  ;;  %v1555_v24 = vmul.f32 %v2102_v46, %v2657_v36 }
 0x4df   : > { %v1610_v55 = vadd.f32 %v2698_v2, %v1582_v20  ;;  %v1558_v35 = vmul.f32 %v2104_v6, %v2665_v1 }
 0x4e0   : > { %1637 = vst.msk [vmem:[%s2707_s18 + $0x98] sm:$0xff] %vm1249_vm2, %v1613_v54  ;;  %v1583_v26 = vmul.f32 %v2693_v49, %v1555_v24 }
 0x4e1   : > { %v2106_v27 = vpop.eup %2105  ;;  %1634 = vst.msk [vmem:[%s2707_s18 + $0x80] sm:$0xff] %vm1249_vm2, %v1610_v55  ;;  %v1586_v28 = vmul.f32 %v2693_v49, %v1558_v35 }
 0x4e2   : > { %v2108_v29 = vpop.eup %2107  ;;  %v1611_v30 = vadd.f32 %v2698_v2, %v1583_v26  ;;  %v1559_v36 = vmul.f32 %v2106_v27, %v2669_v37 }
 0x4e3   : > { %v1614_v39 = vadd.f32 %v2698_v2, %v1586_v28  ;;  %v1560_v1 = vmul.f32 %v2108_v29, %v2675_v61 }
 0x4e4   : > { %1635 = vst.msk [vmem:[%s2707_s18 + $0x88] sm:$0xff] %vm1249_vm2, %v1611_v30  ;;  %v1587_v32 = vmul.f32 %v2693_v49, %v1559_v36 }
 0x4e5   : > { %v2110_v33 = vpop.eup %2109  ;;  %1638 = vst.msk [vmem:[%s2707_s18 + $0xa0] sm:$0xff] %vm1249_vm2, %v1614_v39  ;;  %v1588_v43 = vmul.f32 %v2693_v49, %v1560_v1 }
 0x4e6   : > { %v1615_v13 = vadd.f32 %v2698_v2, %v1587_v32  ;;  %v1561_v62 = vmul.f32 %v2110_v33, %v2681_v19 }
 0x4e7   : > { %v1616_v31 = vadd.f32 %v2698_v2, %v1588_v43 }
 0x4e8   : > { %1639 = vst.msk [vmem:[%s2707_s18 + $0xa8] sm:$0xff] %vm1249_vm2, %v1615_v13  ;;  %v1589_v37 = vmul.f32 %v2693_v49, %v1561_v62 }
 0x4e9   : > { %1640 = vst.msk [vmem:[%s2707_s18 + $0xb0] sm:$0xff] %vm1249_vm2, %v1616_v31 }
 0x4ea   : > { %v1617_v61 = vadd.f32 %v2698_v2, %v1589_v37 }
 0x4ec   : > { %1641 = vst.msk [vmem:[%s2707_s18 + $0xb8] sm:$0xff] %vm1249_vm2, %v1617_v61 }
 0x4ed PF: > { %s16_s21 = sadd.s32 1, %s2117_s21  }
 0x4ee   : > { %p13_p4 = scmp.ge.s32.totalorder %s16_s21, 4  }
 0x4f0   :  { %15 = sbr.rel (!%p13_p4) target bundleno = 1 (0x1), region = 75 }

</bundles_post_ra>
